<compile_context>
chip_gen: v7x
topology: tpu7x:2x2x1
jax: 0.10.0
libtpu: 0.0.40
codegen_flags: <defaults>
</compile_context>

<pallas_src>
import jax
import jax.numpy as jnp
from jax import lax
from jax.experimental import pallas as pl
from jax.experimental.pallas import tpu as pltpu


def _round_up(x, m):
    return ((x + m - 1) // m) * m


def _pick_time_chunk(T, max_chunk):
    """Largest divisor of T that is <= max_chunk (bounds unroll size / VMEM)."""
    for c in range(min(T, max_chunk), 0, -1):
        if T % c == 0:
            return c
    return 1


def lstm_kernel(x_ref, wih_ref, whh_ref, bias_ref, hout_ref,
                gx_scr, h_scr, c_scr):
    """One (batch-tile, time-chunk) grid step of the LSTM.

    x_ref   : (T_CHUNK, B_TILE, D)   time-major input slab for this chunk
    wih_ref : (D, 4*Hp)              input weight, right-multiply, gate slabs
    whh_ref : (Hp, 4*Hp)             recurrent weight, right-multiply, gate slabs
    bias_ref: (1, 4*Hp)              b_ih + b_hh, gate slabs
    hout_ref: (B_TILE, Hp)           h at the last timestep (lane-dense output)
    gx_scr  : (T_CHUNK*B_TILE, 4*Hp) input-projection scratch (VMEM only)
    h_scr/c_scr: (B_TILE, Hp)        state carried across time chunks
    """
    tc = pl.program_id(1)                      # time-chunk axis (sequential)

    @pl.when(tc == 0)
    def _():
        h_scr[...] = jnp.zeros_like(h_scr)
        c_scr[...] = jnp.zeros_like(c_scr)

    t_chunk, b_tile, d = x_ref.shape
    hp = h_scr.shape[-1]

    # Input projection for the whole time chunk in a single MXU pass.
    # Merging (t_chunk, b_tile) is tile-aligned (b_tile % 8 == 0) -> no relayout.
    x2d = x_ref[...].reshape(t_chunk * b_tile, d)
    gx_scr[...] = (
        jnp.dot(x2d, wih_ref[...], preferred_element_type=jnp.float32)
        + bias_ref[...]
    )

    whh = whh_ref[...]                          # load recurrent weight once

    def step(t, carry):
        h, c = carry
        row = pl.multiple_of(t * b_tile, b_tile)
        gates = gx_scr[pl.ds(row, b_tile), :] + jnp.dot(
            h, whh, preferred_element_type=jnp.float32)
        i = jax.nn.sigmoid(gates[:, 0 * hp:1 * hp])
        f = jax.nn.sigmoid(gates[:, 1 * hp:2 * hp])
        g = jnp.tanh(gates[:, 2 * hp:3 * hp])
        o = jax.nn.sigmoid(gates[:, 3 * hp:4 * hp])
        c = f * c + i * g
        h = o * jnp.tanh(c)
        return h, c

    h, c = lax.fori_loop(0, t_chunk, step, (h_scr[...], c_scr[...]),
                         unroll=True)
    h_scr[...] = h
    c_scr[...] = c

    @pl.when(tc == pl.num_programs(1) - 1)
    def _():
        hout_ref[...] = h.astype(hout_ref.dtype)


def lstm_forward(x_btd, w_ih, w_hh, b_ih, b_hh, w_fc, b_fc):
    """x_btd: (B, T, D) float32, PyTorch batch_first=True layout. Returns (B, 1)."""
    B, T, D = x_btd.shape
    H = w_hh.shape[1]

    # ---- tile-friendly padded sizes -------------------------------------
    Hp = max(128, _round_up(H, 128))           # lane-align each gate slab
    if B <= 128:
        B_tile = _round_up(B, 8)               # at least one full sublane
        Bp = B_tile
    else:
        Bp = _round_up(B, 128)
        B_tile = 128
    n_btiles = Bp // B_tile

    # Bound the per-step gate scratch (t_chunk * B_tile * 4Hp * 4 B) to ~2 MiB.
    max_chunk = max(1, min(32, (2 << 20) // (B_tile * 4 * Hp * 4)))
    t_chunk = _pick_time_chunk(T, max_chunk)
    n_tchunks = T // t_chunk

    # ---- time-major, batch-padded input (only x crosses HBM) -------------
    x_tbd = jnp.transpose(x_btd, (1, 0, 2)).astype(jnp.float32)   # (T, B, D)
    x_tbd = jnp.pad(x_tbd, ((0, 0), (0, Bp - B), (0, 0)))         # (T, Bp, D)

    # ---- weights: right-multiply layout, each gate on its own Hp slab ----
    wih_t = jnp.transpose(
        jnp.pad(w_ih.reshape(4, H, D), ((0, 0), (0, Hp - H), (0, 0))),
        (2, 0, 1)).reshape(D, 4 * Hp).astype(jnp.float32)
    whh_t = jnp.transpose(
        jnp.pad(w_hh.reshape(4, H, H), ((0, 0), (0, Hp - H), (0, Hp - H))),
        (2, 0, 1)).reshape(Hp, 4 * Hp).astype(jnp.float32)
    bias = jnp.pad((b_ih + b_hh).reshape(4, H), ((0, 0), (0, Hp - H)))
    bias = bias.reshape(1, 4 * Hp).astype(jnp.float32)
    # TODO(synk): for large H cast wih_t/whh_t and x to bfloat16 (MXU-native,
    # halves resident-weight VMEM) while keeping f32 accumulation and f32 h/c;
    # kept f32 here to match the f32 PyTorch module numerics.

    h_last = pl.pallas_call(
        lstm_kernel,
        out_shape=jax.ShapeDtypeStruct((Bp, Hp), jnp.float32),
        grid=(n_btiles, n_tchunks),
        in_specs=[
            # x: one time chunk per grid step, for this batch tile
            pl.BlockSpec((t_chunk, B_tile, D), lambda b, t: (t, b, 0)),
            # weights / bias: resident, same block every step (no re-DMA)
            pl.BlockSpec((D, 4 * Hp), lambda b, t: (0, 0)),
            pl.BlockSpec((Hp, 4 * Hp), lambda b, t: (0, 0)),
            pl.BlockSpec((1, 4 * Hp), lambda b, t: (0, 0)),
        ],
        # lane-dense h_last output, one block per batch tile
        out_specs=pl.BlockSpec((B_tile, Hp), lambda b, t: (b, 0)),
        scratch_shapes=[
            pltpu.VMEM((t_chunk * B_tile, 4 * Hp), jnp.float32),  # gates_x chunk
            pltpu.VMEM((B_tile, Hp), jnp.float32),                # h state
            pltpu.VMEM((B_tile, Hp), jnp.float32),                # c state
        ],
        compiler_params=pltpu.CompilerParams(
            dimension_semantics=("parallel", "arbitrary")),
    )(x_tbd, wih_t, whh_t, bias)

    # ---- tiny width-1 Linear head: cheaper as a plain XLA op --------------
    h_last = h_last[:B, :H]
    return h_last @ w_fc.T + b_fc


def lstm_reference(x_btd, w_ih, w_hh, b_ih, b_hh, w_fc, b_fc):
    """Pure-JAX reference with PyTorch LSTM semantics (for verification)."""
    B, T, D = x_btd.shape
    H = w_hh.shape[1]

    def step(carry, x_t):
        h, c = carry
        gates = x_t @ w_ih.T + b_ih + h @ w_hh.T + b_hh
        i, f, g, o = jnp.split(gates, 4, axis=-1)
        i, f, o = jax.nn.sigmoid(i), jax.nn.sigmoid(f), jax.nn.sigmoid(o)
        g = jnp.tanh(g)
        c = f * c + i * g
        h = o * jnp.tanh(c)
        return (h, c), h

    init = (jnp.zeros((B, H), jnp.float32), jnp.zeros((B, H), jnp.float32))
    (h_last, _), _ = lax.scan(step, init, jnp.transpose(x_btd, (1, 0, 2)))
    return h_last @ w_fc.T + b_fc


if __name__ == "__main__":
    B, T, D, H = 2, 8, 8, 64   # batch, seq, input_size, hidden_size (spec: 64)

    key = jax.random.PRNGKey(0)
    ks = jax.random.split(key, 7)
    bound = 1.0 / jnp.sqrt(H)
    u = lambda k, shape: jax.random.uniform(k, shape, jnp.float32, -bound, bound)

    x = jax.random.normal(ks[0], (B, T, D), jnp.float32)
    w_ih = u(ks[1], (4 * H, D))
    w_hh = u(ks[2], (4 * H, H))
    b_ih = u(ks[3], (4 * H,))
    b_hh = u(ks[4], (4 * H,))
    w_fc = u(ks[5], (1, H))
    b_fc = u(ks[6], (1,))

    y = lstm_forward(x, w_ih, w_hh, b_ih, b_hh, w_fc, b_fc)
    y = jax.block_until_ready(y)

    y_ref = lstm_reference(x, w_ih, w_hh, b_ih, b_hh, w_fc, b_fc)
    assert y.shape == (B, 1)
    assert jnp.allclose(y, y_ref, atol=2e-5, rtol=2e-5), (y, y_ref)

    print("KERNEL_OK")
</pallas_src>

<mosaic_0001>
module attributes {stable_mosaic.version = 11 : i64} {
  func.func @lstm_kernel(%arg0: i32, %arg1: i32, %arg2: memref<8x8x8xf32, #tpu.memory_space<vmem>>, %arg3: memref<8x512xf32, #tpu.memory_space<vmem>>, %arg4: memref<128x512xf32, #tpu.memory_space<vmem>>, %arg5: memref<1x512xf32, #tpu.memory_space<vmem>>, %arg6: memref<8x128xf32, #tpu.memory_space<vmem>>, %arg7: memref<64x512xf32, #tpu.memory_space<vmem>>, %arg8: memref<8x128xf32, #tpu.memory_space<vmem>>, %arg9: memref<8x128xf32, #tpu.memory_space<vmem>>) attributes {dimension_semantics = [#tpu.dimension_semantics<parallel>, #tpu.dimension_semantics<arbitrary>], iteration_bounds = array<i64: 1, 1>, scalar_prefetch = 0 : i64, scratch_operands = 3 : i64, tpu.core_type = #tpu.core_type<tc>, window_params = [{transform_indices = @transform_0, window_bounds = array<i64: 8, 8, 8>}, {pipeline_mode = #tpu.pipeline_mode<synchronous>, transform_indices = @transform_1, window_bounds = array<i64: 8, 512>}, {pipeline_mode = #tpu.pipeline_mode<synchronous>, transform_indices = @transform_2, window_bounds = array<i64: 128, 512>}, {pipeline_mode = #tpu.pipeline_mode<synchronous>, transform_indices = @transform_3, window_bounds = array<i64: 1, 512>}, {transform_indices = @transform_4, window_bounds = array<i64: 8, 128>}]} {
    %c0_i32 = arith.constant 0 : i32
    %0 = arith.cmpi eq, %arg1, %c0_i32 : i32
    %1 = arith.extui %0 : i1 to i32
    %c0_i32_0 = arith.constant 0 : i32
    %2 = arith.cmpi ne, %1, %c0_i32_0 : i32
    scf.if %2 {
      %cst_70 = arith.constant 0.000000e+00 : f32
      %267 = vector.broadcast %cst_70 : f32 to vector<8x128xf32>
      %c0_71 = arith.constant 0 : index
      %c0_72 = arith.constant 0 : index
      %268 = vector.load %arg8[%c0_71, %c0_72] : memref<8x128xf32, #tpu.memory_space<vmem>>, vector<8x128xf32>
      tpu.vector_store %arg8[%c0_71, %c0_72], %267 {strides = array<i32>} : memref<8x128xf32, #tpu.memory_space<vmem>>, vector<8x128xf32>,
      %cst_73 = arith.constant 0.000000e+00 : f32
      %269 = vector.broadcast %cst_73 : f32 to vector<8x128xf32>
      %c0_74 = arith.constant 0 : index
      %c0_75 = arith.constant 0 : index
      %270 = vector.load %arg9[%c0_74, %c0_75] : memref<8x128xf32, #tpu.memory_space<vmem>>, vector<8x128xf32>
      tpu.vector_store %arg9[%c0_74, %c0_75], %269 {strides = array<i32>} : memref<8x128xf32, #tpu.memory_space<vmem>>, vector<8x128xf32>,
    } else {
    }
    %c0 = arith.constant 0 : index
    %c0_1 = arith.constant 0 : index
    %c0_2 = arith.constant 0 : index
    %3 = vector.load %arg2[%c0, %c0_1, %c0_2] : memref<8x8x8xf32, #tpu.memory_space<vmem>>, vector<8x8x8xf32>
    %4 = vector.shape_cast %3 : vector<8x8x8xf32> to vector<64x8xf32>
    %c0_3 = arith.constant 0 : index
    %c0_4 = arith.constant 0 : index
    %5 = vector.load %arg3[%c0_3, %c0_4] : memref<8x512xf32, #tpu.memory_space<vmem>>, vector<8x512xf32>
    %cst = arith.constant dense<0.000000e+00> : vector<64x512xf32>
    %6 = tpu.matmul %4, %5, %cst {dimension_numbers = #tpu.dot_dimension_numbers<[1], [0], [0], [1], [0, 0, 1, 1], [], []>} : vector<64x8xf32>, vector<8x512xf32>, vector<64x512xf32> -> vector<64x512xf32>
    %c0_5 = arith.constant 0 : index
    %c0_6 = arith.constant 0 : index
    %7 = vector.load %arg5[%c0_5, %c0_6] : memref<1x512xf32, #tpu.memory_space<vmem>>, vector<1x512xf32>
    %8 = vector.broadcast %7 : vector<1x512xf32> to vector<64x512xf32>
    %9 = arith.addf %6, %8 : vector<64x512xf32>
    %c0_7 = arith.constant 0 : index
    %c0_8 = arith.constant 0 : index
    %10 = vector.load %arg7[%c0_7, %c0_8] : memref<64x512xf32, #tpu.memory_space<vmem>>, vector<64x512xf32>
    tpu.vector_store %arg7[%c0_7, %c0_8], %9 {strides = array<i32>} : memref<64x512xf32, #tpu.memory_space<vmem>>, vector<64x512xf32>,
    %c0_9 = arith.constant 0 : index
    %c0_10 = arith.constant 0 : index
    %11 = vector.load %arg4[%c0_9, %c0_10] : memref<128x512xf32, #tpu.memory_space<vmem>>, vector<128x512xf32>
    %c0_11 = arith.constant 0 : index
    %c0_12 = arith.constant 0 : index
    %12 = vector.load %arg8[%c0_11, %c0_12] : memref<8x128xf32, #tpu.memory_space<vmem>>, vector<8x128xf32>
    %c0_13 = arith.constant 0 : index
    %c0_14 = arith.constant 0 : index
    %13 = vector.load %arg9[%c0_13, %c0_14] : memref<8x128xf32, #tpu.memory_space<vmem>>, vector<8x128xf32>
    %c0_i32_15 = arith.constant 0 : i32
    %c8_i32 = arith.constant 8 : i32
    %14 = arith.muli %c0_i32_15, %c8_i32 : i32
    %15 = tpu.assume_multiple %14, 8 : i32
    %16 = arith.index_cast %15 : i32 to index
    %c0_16 = arith.constant 0 : index
    %17 = vector.load %arg7[%16, %c0_16] : memref<64x512xf32, #tpu.memory_space<vmem>>, vector<8x512xf32>
    %cst_17 = arith.constant dense<0.000000e+00> : vector<8x512xf32>
    %18 = tpu.matmul %12, %11, %cst_17 {dimension_numbers = #tpu.dot_dimension_numbers<[1], [0], [0], [1], [0, 0, 1, 1], [], []>} : vector<8x128xf32>, vector<128x512xf32>, vector<8x512xf32> -> vector<8x512xf32>
    %19 = arith.addf %17, %18 : vector<8x512xf32>
    %20 = vector.extract_strided_slice %19 {offsets = [0, 0], sizes = [8, 128], strides = [1, 1]} : vector<8x512xf32> to vector<8x128xf32>
    %21 = arith.negf %20 : vector<8x128xf32>
    %22 = math.exp %21 : vector<8x128xf32>
    %cst_18 = arith.constant 1.000000e+00 : f32
    %23 = vector.broadcast %cst_18 : f32 to vector<8x128xf32>
    %24 = arith.addf %23, %22 : vector<8x128xf32>
    %25 = arith.divf %23, %24 : vector<8x128xf32>
    %26 = vector.extract_strided_slice %19 {offsets = [0, 128], sizes = [8, 128], strides = [1, 1]} : vector<8x512xf32> to vector<8x128xf32>
    %27 = arith.negf %26 : vector<8x128xf32>
    %28 = math.exp %27 : vector<8x128xf32>
    %cst_19 = arith.constant 1.000000e+00 : f32
    %29 = vector.broadcast %cst_19 : f32 to vector<8x128xf32>
    %30 = arith.addf %29, %28 : vector<8x128xf32>
    %31 = arith.divf %29, %30 : vector<8x128xf32>
    %32 = vector.extract_strided_slice %19 {offsets = [0, 256], sizes = [8, 128], strides = [1, 1]} : vector<8x512xf32> to vector<8x128xf32>
    %33 = math.tanh %32 : vector<8x128xf32>
    %34 = vector.extract_strided_slice %19 {offsets = [0, 384], sizes = [8, 128], strides = [1, 1]} : vector<8x512xf32> to vector<8x128xf32>
    %35 = arith.negf %34 : vector<8x128xf32>
    %36 = math.exp %35 : vector<8x128xf32>
    %cst_20 = arith.constant 1.000000e+00 : f32
    %37 = vector.broadcast %cst_20 : f32 to vector<8x128xf32>
    %38 = arith.addf %37, %36 : vector<8x128xf32>
    %39 = arith.divf %37, %38 : vector<8x128xf32>
    %40 = arith.mulf %31, %13 : vector<8x128xf32>
    %41 = arith.mulf %25, %33 : vector<8x128xf32>
    %42 = arith.addf %40, %41 : vector<8x128xf32>
    %43 = math.tanh %42 : vector<8x128xf32>
    %44 = arith.mulf %39, %43 : vector<8x128xf32>
    %c1_i32 = arith.constant 1 : i32
    %c8_i32_21 = arith.constant 8 : i32
    %45 = arith.muli %c1_i32, %c8_i32_21 : i32
    %46 = tpu.assume_multiple %45, 8 : i32
    %47 = arith.index_cast %46 : i32 to index
    %c0_22 = arith.constant 0 : index
    %48 = vector.load %arg7[%47, %c0_22] : memref<64x512xf32, #tpu.memory_space<vmem>>, vector<8x512xf32>
    %cst_23 = arith.constant dense<0.000000e+00> : vector<8x512xf32>
    %49 = tpu.matmul %44, %11, %cst_23 {dimension_numbers = #tpu.dot_dimension_numbers<[1], [0], [0], [1], [0, 0, 1, 1], [], []>} : vector<8x128xf32>, vector<128x512xf32>, vector<8x512xf32> -> vector<8x512xf32>
    %50 = arith.addf %48, %49 : vector<8x512xf32>
    %51 = vector.extract_strided_slice %50 {offsets = [0, 0], sizes = [8, 128], strides = [1, 1]} : vector<8x512xf32> to vector<8x128xf32>
    %52 = arith.negf %51 : vector<8x128xf32>
    %53 = math.exp %52 : vector<8x128xf32>
    %cst_24 = arith.constant 1.000000e+00 : f32
    %54 = vector.broadcast %cst_24 : f32 to vector<8x128xf32>
    %55 = arith.addf %54, %53 : vector<8x128xf32>
    %56 = arith.divf %54, %55 : vector<8x128xf32>
    %57 = vector.extract_strided_slice %50 {offsets = [0, 128], sizes = [8, 128], strides = [1, 1]} : vector<8x512xf32> to vector<8x128xf32>
    %58 = arith.negf %57 : vector<8x128xf32>
    %59 = math.exp %58 : vector<8x128xf32>
    %cst_25 = arith.constant 1.000000e+00 : f32
    %60 = vector.broadcast %cst_25 : f32 to vector<8x128xf32>
    %61 = arith.addf %60, %59 : vector<8x128xf32>
    %62 = arith.divf %60, %61 : vector<8x128xf32>
    %63 = vector.extract_strided_slice %50 {offsets = [0, 256], sizes = [8, 128], strides = [1, 1]} : vector<8x512xf32> to vector<8x128xf32>
    %64 = math.tanh %63 : vector<8x128xf32>
    %65 = vector.extract_strided_slice %50 {offsets = [0, 384], sizes = [8, 128], strides = [1, 1]} : vector<8x512xf32> to vector<8x128xf32>
    %66 = arith.negf %65 : vector<8x128xf32>
    %67 = math.exp %66 : vector<8x128xf32>
    %cst_26 = arith.constant 1.000000e+00 : f32
    %68 = vector.broadcast %cst_26 : f32 to vector<8x128xf32>
    %69 = arith.addf %68, %67 : vector<8x128xf32>
    %70 = arith.divf %68, %69 : vector<8x128xf32>
    %71 = arith.mulf %62, %42 : vector<8x128xf32>
    %72 = arith.mulf %56, %64 : vector<8x128xf32>
    %73 = arith.addf %71, %72 : vector<8x128xf32>
    %74 = math.tanh %73 : vector<8x128xf32>
    %75 = arith.mulf %70, %74 : vector<8x128xf32>
    %c2_i32 = arith.constant 2 : i32
    %c8_i32_27 = arith.constant 8 : i32
    %76 = arith.muli %c2_i32, %c8_i32_27 : i32
    %77 = tpu.assume_multiple %76, 8 : i32
    %78 = arith.index_cast %77 : i32 to index
    %c0_28 = arith.constant 0 : index
    %79 = vector.load %arg7[%78, %c0_28] : memref<64x512xf32, #tpu.memory_space<vmem>>, vector<8x512xf32>
    %cst_29 = arith.constant dense<0.000000e+00> : vector<8x512xf32>
    %80 = tpu.matmul %75, %11, %cst_29 {dimension_numbers = #tpu.dot_dimension_numbers<[1], [0], [0], [1], [0, 0, 1, 1], [], []>} : vector<8x128xf32>, vector<128x512xf32>, vector<8x512xf32> -> vector<8x512xf32>
    %81 = arith.addf %79, %80 : vector<8x512xf32>
    %82 = vector.extract_strided_slice %81 {offsets = [0, 0], sizes = [8, 128], strides = [1, 1]} : vector<8x512xf32> to vector<8x128xf32>
    %83 = arith.negf %82 : vector<8x128xf32>
    %84 = math.exp %83 : vector<8x128xf32>
    %cst_30 = arith.constant 1.000000e+00 : f32
    %85 = vector.broadcast %cst_30 : f32 to vector<8x128xf32>
    %86 = arith.addf %85, %84 : vector<8x128xf32>
    %87 = arith.divf %85, %86 : vector<8x128xf32>
    %88 = vector.extract_strided_slice %81 {offsets = [0, 128], sizes = [8, 128], strides = [1, 1]} : vector<8x512xf32> to vector<8x128xf32>
    %89 = arith.negf %88 : vector<8x128xf32>
    %90 = math.exp %89 : vector<8x128xf32>
    %cst_31 = arith.constant 1.000000e+00 : f32
    %91 = vector.broadcast %cst_31 : f32 to vector<8x128xf32>
    %92 = arith.addf %91, %90 : vector<8x128xf32>
    %93 = arith.divf %91, %92 : vector<8x128xf32>
    %94 = vector.extract_strided_slice %81 {offsets = [0, 256], sizes = [8, 128], strides = [1, 1]} : vector<8x512xf32> to vector<8x128xf32>
    %95 = math.tanh %94 : vector<8x128xf32>
    %96 = vector.extract_strided_slice %81 {offsets = [0, 384], sizes = [8, 128], strides = [1, 1]} : vector<8x512xf32> to vector<8x128xf32>
    %97 = arith.negf %96 : vector<8x128xf32>
    %98 = math.exp %97 : vector<8x128xf32>
    %cst_32 = arith.constant 1.000000e+00 : f32
    %99 = vector.broadcast %cst_32 : f32 to vector<8x128xf32>
    %100 = arith.addf %99, %98 : vector<8x128xf32>
    %101 = arith.divf %99, %100 : vector<8x128xf32>
    %102 = arith.mulf %93, %73 : vector<8x128xf32>
    %103 = arith.mulf %87, %95 : vector<8x128xf32>
    %104 = arith.addf %102, %103 : vector<8x128xf32>
    %105 = math.tanh %104 : vector<8x128xf32>
    %106 = arith.mulf %101, %105 : vector<8x128xf32>
    %c3_i32 = arith.constant 3 : i32
    %c8_i32_33 = arith.constant 8 : i32
    %107 = arith.muli %c3_i32, %c8_i32_33 : i32
    %108 = tpu.assume_multiple %107, 8 : i32
    %109 = arith.index_cast %108 : i32 to index
    %c0_34 = arith.constant 0 : index
    %110 = vector.load %arg7[%109, %c0_34] : memref<64x512xf32, #tpu.memory_space<vmem>>, vector<8x512xf32>
    %cst_35 = arith.constant dense<0.000000e+00> : vector<8x512xf32>
    %111 = tpu.matmul %106, %11, %cst_35 {dimension_numbers = #tpu.dot_dimension_numbers<[1], [0], [0], [1], [0, 0, 1, 1], [], []>} : vector<8x128xf32>, vector<128x512xf32>, vector<8x512xf32> -> vector<8x512xf32>
    %112 = arith.addf %110, %111 : vector<8x512xf32>
    %113 = vector.extract_strided_slice %112 {offsets = [0, 0], sizes = [8, 128], strides = [1, 1]} : vector<8x512xf32> to vector<8x128xf32>
    %114 = arith.negf %113 : vector<8x128xf32>
    %115 = math.exp %114 : vector<8x128xf32>
    %cst_36 = arith.constant 1.000000e+00 : f32
    %116 = vector.broadcast %cst_36 : f32 to vector<8x128xf32>
    %117 = arith.addf %116, %115 : vector<8x128xf32>
    %118 = arith.divf %116, %117 : vector<8x128xf32>
    %119 = vector.extract_strided_slice %112 {offsets = [0, 128], sizes = [8, 128], strides = [1, 1]} : vector<8x512xf32> to vector<8x128xf32>
    %120 = arith.negf %119 : vector<8x128xf32>
    %121 = math.exp %120 : vector<8x128xf32>
    %cst_37 = arith.constant 1.000000e+00 : f32
    %122 = vector.broadcast %cst_37 : f32 to vector<8x128xf32>
    %123 = arith.addf %122, %121 : vector<8x128xf32>
    %124 = arith.divf %122, %123 : vector<8x128xf32>
    %125 = vector.extract_strided_slice %112 {offsets = [0, 256], sizes = [8, 128], strides = [1, 1]} : vector<8x512xf32> to vector<8x128xf32>
    %126 = math.tanh %125 : vector<8x128xf32>
    %127 = vector.extract_strided_slice %112 {offsets = [0, 384], sizes = [8, 128], strides = [1, 1]} : vector<8x512xf32> to vector<8x128xf32>
    %128 = arith.negf %127 : vector<8x128xf32>
    %129 = math.exp %128 : vector<8x128xf32>
    %cst_38 = arith.constant 1.000000e+00 : f32
    %130 = vector.broadcast %cst_38 : f32 to vector<8x128xf32>
    %131 = arith.addf %130, %129 : vector<8x128xf32>
    %132 = arith.divf %130, %131 : vector<8x128xf32>
    %133 = arith.mulf %124, %104 : vector<8x128xf32>
    %134 = arith.mulf %118, %126 : vector<8x128xf32>
    %135 = arith.addf %133, %134 : vector<8x128xf32>
    %136 = math.tanh %135 : vector<8x128xf32>
    %137 = arith.mulf %132, %136 : vector<8x128xf32>
    %c4_i32 = arith.constant 4 : i32
    %c8_i32_39 = arith.constant 8 : i32
    %138 = arith.muli %c4_i32, %c8_i32_39 : i32
    %139 = tpu.assume_multiple %138, 8 : i32
    %140 = arith.index_cast %139 : i32 to index
    %c0_40 = arith.constant 0 : index
    %141 = vector.load %arg7[%140, %c0_40] : memref<64x512xf32, #tpu.memory_space<vmem>>, vector<8x512xf32>
    %cst_41 = arith.constant dense<0.000000e+00> : vector<8x512xf32>
    %142 = tpu.matmul %137, %11, %cst_41 {dimension_numbers = #tpu.dot_dimension_numbers<[1], [0], [0], [1], [0, 0, 1, 1], [], []>} : vector<8x128xf32>, vector<128x512xf32>, vector<8x512xf32> -> vector<8x512xf32>
    %143 = arith.addf %141, %142 : vector<8x512xf32>
    %144 = vector.extract_strided_slice %143 {offsets = [0, 0], sizes = [8, 128], strides = [1, 1]} : vector<8x512xf32> to vector<8x128xf32>
    %145 = arith.negf %144 : vector<8x128xf32>
    %146 = math.exp %145 : vector<8x128xf32>
    %cst_42 = arith.constant 1.000000e+00 : f32
    %147 = vector.broadcast %cst_42 : f32 to vector<8x128xf32>
    %148 = arith.addf %147, %146 : vector<8x128xf32>
    %149 = arith.divf %147, %148 : vector<8x128xf32>
    %150 = vector.extract_strided_slice %143 {offsets = [0, 128], sizes = [8, 128], strides = [1, 1]} : vector<8x512xf32> to vector<8x128xf32>
    %151 = arith.negf %150 : vector<8x128xf32>
    %152 = math.exp %151 : vector<8x128xf32>
    %cst_43 = arith.constant 1.000000e+00 : f32
    %153 = vector.broadcast %cst_43 : f32 to vector<8x128xf32>
    %154 = arith.addf %153, %152 : vector<8x128xf32>
    %155 = arith.divf %153, %154 : vector<8x128xf32>
    %156 = vector.extract_strided_slice %143 {offsets = [0, 256], sizes = [8, 128], strides = [1, 1]} : vector<8x512xf32> to vector<8x128xf32>
    %157 = math.tanh %156 : vector<8x128xf32>
    %158 = vector.extract_strided_slice %143 {offsets = [0, 384], sizes = [8, 128], strides = [1, 1]} : vector<8x512xf32> to vector<8x128xf32>
    %159 = arith.negf %158 : vector<8x128xf32>
    %160 = math.exp %159 : vector<8x128xf32>
    %cst_44 = arith.constant 1.000000e+00 : f32
    %161 = vector.broadcast %cst_44 : f32 to vector<8x128xf32>
    %162 = arith.addf %161, %160 : vector<8x128xf32>
    %163 = arith.divf %161, %162 : vector<8x128xf32>
    %164 = arith.mulf %155, %135 : vector<8x128xf32>
    %165 = arith.mulf %149, %157 : vector<8x128xf32>
    %166 = arith.addf %164, %165 : vector<8x128xf32>
    %167 = math.tanh %166 : vector<8x128xf32>
    %168 = arith.mulf %163, %167 : vector<8x128xf32>
    %c5_i32 = arith.constant 5 : i32
    %c8_i32_45 = arith.constant 8 : i32
    %169 = arith.muli %c5_i32, %c8_i32_45 : i32
    %170 = tpu.assume_multiple %169, 8 : i32
    %171 = arith.index_cast %170 : i32 to index
    %c0_46 = arith.constant 0 : index
    %172 = vector.load %arg7[%171, %c0_46] : memref<64x512xf32, #tpu.memory_space<vmem>>, vector<8x512xf32>
    %cst_47 = arith.constant dense<0.000000e+00> : vector<8x512xf32>
    %173 = tpu.matmul %168, %11, %cst_47 {dimension_numbers = #tpu.dot_dimension_numbers<[1], [0], [0], [1], [0, 0, 1, 1], [], []>} : vector<8x128xf32>, vector<128x512xf32>, vector<8x512xf32> -> vector<8x512xf32>
    %174 = arith.addf %172, %173 : vector<8x512xf32>
    %175 = vector.extract_strided_slice %174 {offsets = [0, 0], sizes = [8, 128], strides = [1, 1]} : vector<8x512xf32> to vector<8x128xf32>
    %176 = arith.negf %175 : vector<8x128xf32>
    %177 = math.exp %176 : vector<8x128xf32>
    %cst_48 = arith.constant 1.000000e+00 : f32
    %178 = vector.broadcast %cst_48 : f32 to vector<8x128xf32>
    %179 = arith.addf %178, %177 : vector<8x128xf32>
    %180 = arith.divf %178, %179 : vector<8x128xf32>
    %181 = vector.extract_strided_slice %174 {offsets = [0, 128], sizes = [8, 128], strides = [1, 1]} : vector<8x512xf32> to vector<8x128xf32>
    %182 = arith.negf %181 : vector<8x128xf32>
    %183 = math.exp %182 : vector<8x128xf32>
    %cst_49 = arith.constant 1.000000e+00 : f32
    %184 = vector.broadcast %cst_49 : f32 to vector<8x128xf32>
    %185 = arith.addf %184, %183 : vector<8x128xf32>
    %186 = arith.divf %184, %185 : vector<8x128xf32>
    %187 = vector.extract_strided_slice %174 {offsets = [0, 256], sizes = [8, 128], strides = [1, 1]} : vector<8x512xf32> to vector<8x128xf32>
    %188 = math.tanh %187 : vector<8x128xf32>
    %189 = vector.extract_strided_slice %174 {offsets = [0, 384], sizes = [8, 128], strides = [1, 1]} : vector<8x512xf32> to vector<8x128xf32>
    %190 = arith.negf %189 : vector<8x128xf32>
    %191 = math.exp %190 : vector<8x128xf32>
    %cst_50 = arith.constant 1.000000e+00 : f32
    %192 = vector.broadcast %cst_50 : f32 to vector<8x128xf32>
    %193 = arith.addf %192, %191 : vector<8x128xf32>
    %194 = arith.divf %192, %193 : vector<8x128xf32>
    %195 = arith.mulf %186, %166 : vector<8x128xf32>
    %196 = arith.mulf %180, %188 : vector<8x128xf32>
    %197 = arith.addf %195, %196 : vector<8x128xf32>
    %198 = math.tanh %197 : vector<8x128xf32>
    %199 = arith.mulf %194, %198 : vector<8x128xf32>
    %c6_i32 = arith.constant 6 : i32
    %c8_i32_51 = arith.constant 8 : i32
    %200 = arith.muli %c6_i32, %c8_i32_51 : i32
    %201 = tpu.assume_multiple %200, 8 : i32
    %202 = arith.index_cast %201 : i32 to index
    %c0_52 = arith.constant 0 : index
    %203 = vector.load %arg7[%202, %c0_52] : memref<64x512xf32, #tpu.memory_space<vmem>>, vector<8x512xf32>
    %cst_53 = arith.constant dense<0.000000e+00> : vector<8x512xf32>
    %204 = tpu.matmul %199, %11, %cst_53 {dimension_numbers = #tpu.dot_dimension_numbers<[1], [0], [0], [1], [0, 0, 1, 1], [], []>} : vector<8x128xf32>, vector<128x512xf32>, vector<8x512xf32> -> vector<8x512xf32>
    %205 = arith.addf %203, %204 : vector<8x512xf32>
    %206 = vector.extract_strided_slice %205 {offsets = [0, 0], sizes = [8, 128], strides = [1, 1]} : vector<8x512xf32> to vector<8x128xf32>
    %207 = arith.negf %206 : vector<8x128xf32>
    %208 = math.exp %207 : vector<8x128xf32>
    %cst_54 = arith.constant 1.000000e+00 : f32
    %209 = vector.broadcast %cst_54 : f32 to vector<8x128xf32>
    %210 = arith.addf %209, %208 : vector<8x128xf32>
    %211 = arith.divf %209, %210 : vector<8x128xf32>
    %212 = vector.extract_strided_slice %205 {offsets = [0, 128], sizes = [8, 128], strides = [1, 1]} : vector<8x512xf32> to vector<8x128xf32>
    %213 = arith.negf %212 : vector<8x128xf32>
    %214 = math.exp %213 : vector<8x128xf32>
    %cst_55 = arith.constant 1.000000e+00 : f32
    %215 = vector.broadcast %cst_55 : f32 to vector<8x128xf32>
    %216 = arith.addf %215, %214 : vector<8x128xf32>
    %217 = arith.divf %215, %216 : vector<8x128xf32>
    %218 = vector.extract_strided_slice %205 {offsets = [0, 256], sizes = [8, 128], strides = [1, 1]} : vector<8x512xf32> to vector<8x128xf32>
    %219 = math.tanh %218 : vector<8x128xf32>
    %220 = vector.extract_strided_slice %205 {offsets = [0, 384], sizes = [8, 128], strides = [1, 1]} : vector<8x512xf32> to vector<8x128xf32>
    %221 = arith.negf %220 : vector<8x128xf32>
    %222 = math.exp %221 : vector<8x128xf32>
    %cst_56 = arith.constant 1.000000e+00 : f32
    %223 = vector.broadcast %cst_56 : f32 to vector<8x128xf32>
    %224 = arith.addf %223, %222 : vector<8x128xf32>
    %225 = arith.divf %223, %224 : vector<8x128xf32>
    %226 = arith.mulf %217, %197 : vector<8x128xf32>
    %227 = arith.mulf %211, %219 : vector<8x128xf32>
    %228 = arith.addf %226, %227 : vector<8x128xf32>
    %229 = math.tanh %228 : vector<8x128xf32>
    %230 = arith.mulf %225, %229 : vector<8x128xf32>
    %c7_i32 = arith.constant 7 : i32
    %c8_i32_57 = arith.constant 8 : i32
    %231 = arith.muli %c7_i32, %c8_i32_57 : i32
    %232 = tpu.assume_multiple %231, 8 : i32
    %233 = arith.index_cast %232 : i32 to index
    %c0_58 = arith.constant 0 : index
    %234 = vector.load %arg7[%233, %c0_58] : memref<64x512xf32, #tpu.memory_space<vmem>>, vector<8x512xf32>
    %cst_59 = arith.constant dense<0.000000e+00> : vector<8x512xf32>
    %235 = tpu.matmul %230, %11, %cst_59 {dimension_numbers = #tpu.dot_dimension_numbers<[1], [0], [0], [1], [0, 0, 1, 1], [], []>} : vector<8x128xf32>, vector<128x512xf32>, vector<8x512xf32> -> vector<8x512xf32>
    %236 = arith.addf %234, %235 : vector<8x512xf32>
    %237 = vector.extract_strided_slice %236 {offsets = [0, 0], sizes = [8, 128], strides = [1, 1]} : vector<8x512xf32> to vector<8x128xf32>
    %238 = arith.negf %237 : vector<8x128xf32>
    %239 = math.exp %238 : vector<8x128xf32>
    %cst_60 = arith.constant 1.000000e+00 : f32
    %240 = vector.broadcast %cst_60 : f32 to vector<8x128xf32>
    %241 = arith.addf %240, %239 : vector<8x128xf32>
    %242 = arith.divf %240, %241 : vector<8x128xf32>
    %243 = vector.extract_strided_slice %236 {offsets = [0, 128], sizes = [8, 128], strides = [1, 1]} : vector<8x512xf32> to vector<8x128xf32>
    %244 = arith.negf %243 : vector<8x128xf32>
    %245 = math.exp %244 : vector<8x128xf32>
    %cst_61 = arith.constant 1.000000e+00 : f32
    %246 = vector.broadcast %cst_61 : f32 to vector<8x128xf32>
    %247 = arith.addf %246, %245 : vector<8x128xf32>
    %248 = arith.divf %246, %247 : vector<8x128xf32>
    %249 = vector.extract_strided_slice %236 {offsets = [0, 256], sizes = [8, 128], strides = [1, 1]} : vector<8x512xf32> to vector<8x128xf32>
    %250 = math.tanh %249 : vector<8x128xf32>
    %251 = vector.extract_strided_slice %236 {offsets = [0, 384], sizes = [8, 128], strides = [1, 1]} : vector<8x512xf32> to vector<8x128xf32>
    %252 = arith.negf %251 : vector<8x128xf32>
    %253 = math.exp %252 : vector<8x128xf32>
    %cst_62 = arith.constant 1.000000e+00 : f32
    %254 = vector.broadcast %cst_62 : f32 to vector<8x128xf32>
    %255 = arith.addf %254, %253 : vector<8x128xf32>
    %256 = arith.divf %254, %255 : vector<8x128xf32>
    %257 = arith.mulf %248, %228 : vector<8x128xf32>
    %258 = arith.mulf %242, %250 : vector<8x128xf32>
    %259 = arith.addf %257, %258 : vector<8x128xf32>
    %260 = math.tanh %259 : vector<8x128xf32>
    %261 = arith.mulf %256, %260 : vector<8x128xf32>
    %c8_i32_63 = arith.constant 8 : i32
    %c0_64 = arith.constant 0 : index
    %c0_65 = arith.constant 0 : index
    %262 = vector.load %arg8[%c0_64, %c0_65] : memref<8x128xf32, #tpu.memory_space<vmem>>, vector<8x128xf32>
    tpu.vector_store %arg8[%c0_64, %c0_65], %261 {strides = array<i32>} : memref<8x128xf32, #tpu.memory_space<vmem>>, vector<8x128xf32>,
    %c0_66 = arith.constant 0 : index
    %c0_67 = arith.constant 0 : index
    %263 = vector.load %arg9[%c0_66, %c0_67] : memref<8x128xf32, #tpu.memory_space<vmem>>, vector<8x128xf32>
    tpu.vector_store %arg9[%c0_66, %c0_67], %259 {strides = array<i32>} : memref<8x128xf32, #tpu.memory_space<vmem>>, vector<8x128xf32>,
    %c0_i32_68 = arith.constant 0 : i32
    %264 = arith.cmpi eq, %arg1, %c0_i32_68 : i32
    %265 = arith.extui %264 : i1 to i32
    %c0_i32_69 = arith.constant 0 : i32
    %266 = arith.cmpi ne, %265, %c0_i32_69 : i32
    scf.if %266 {
      %c0_70 = arith.constant 0 : index
      %c0_71 = arith.constant 0 : index
      %267 = vector.load %arg6[%c0_70, %c0_71] : memref<8x128xf32, #tpu.memory_space<vmem>>, vector<8x128xf32>
      tpu.vector_store %arg6[%c0_70, %c0_71], %261 {strides = array<i32>} : memref<8x128xf32, #tpu.memory_space<vmem>>, vector<8x128xf32>,
    } else {
    }
    return
  }
  func.func @transform_0(%arg0: i32, %arg1: i32) -> (i32, i32, i32) {
    %c0_i32 = arith.constant 0 : i32
    %c0_i32_0 = arith.constant 0 : i32
    return %arg1, %arg0, %c0_i32 : i32, i32, i32
  }
  func.func @transform_1(%arg0: i32, %arg1: i32) -> (i32, i32) {
    %c0_i32 = arith.constant 0 : i32
    %c0_i32_0 = arith.constant 0 : i32
    %c0_i32_1 = arith.constant 0 : i32
    return %c0_i32, %c0_i32_0 : i32, i32
  }
  func.func @transform_2(%arg0: i32, %arg1: i32) -> (i32, i32) {
    %c0_i32 = arith.constant 0 : i32
    %c0_i32_0 = arith.constant 0 : i32
    %c0_i32_1 = arith.constant 0 : i32
    return %c0_i32, %c0_i32_0 : i32, i32
  }
  func.func @transform_3(%arg0: i32, %arg1: i32) -> (i32, i32) {
    %c0_i32 = arith.constant 0 : i32
    %c0_i32_0 = arith.constant 0 : i32
    %c0_i32_1 = arith.constant 0 : i32
    return %c0_i32, %c0_i32_0 : i32, i32
  }
  func.func @transform_4(%arg0: i32, %arg1: i32) -> (i32, i32) {
    %c0_i32 = arith.constant 0 : i32
    %c0_i32_0 = arith.constant 0 : i32
    return %arg0, %c0_i32 : i32, i32
  }
}

</mosaic_0001>

<bundles_post_ra>
// kernel: tpu_custom_call.1
= control target key start
LH: loop header
LB: loop body
LE: loop exit
PB: predicated region body
PF: predicated region fallthrough
CT: control target
= control target key end

     0   :  { %9 = vsyncpa [#allocation6], 0  ;;  %s3264_s0 = inlined_call_operand.hbm [shape: f32[8,8,8], index: 0, kind: input, shape index: {}]   ;;  %s3265_s1 = inlined_call_operand.hbm [shape: f32[8,512], index: 1, kind: input, shape index: {}]   ;;  %s3266_s2 = inlined_call_operand.hbm [shape: f32[128,512], index: 2, kind: input, shape index: {}]   ;;  %s3267_s3 = inlined_call_operand.vmem [shape: f32[1,512], index: 3, kind: input, shape index: {}]   ;;  %s3268_s4 = inlined_call_operand.hbm [shape: f32[8,128], index: 4, kind: output, shape index: {}]  }
   0x1   :  { %10 = vsyncpa [#allocation9], 0 }
   0x2   :  { %11 = vsyncpa [#allocation7], 0  ;;  %s2738_s15 = smov [#allocation8]   ;;  %s2739_s17 = smov [#allocation5]  }
   0x3   :  { %s30_s16 = sshll.u32 %s2738_s15, 4  ;;  %s17_s18 = sshll.u32 %s2739_s17, 4  ;;  %s31_s16 = int_to_ptr.vmem [resolvable:$true] %s30_s16  ;;  %s2772_s18 = int_to_ptr.vmem [resolvable:$true] %s17_s18 }
   0x4   :  { %s2644_s21 = scalar_lea.hbm %s3265_s1, 512 }
   0x5   :  { %p2645_p0 = scmp.ne.s32.totalorder %s3265_s1, %s2644_s21  ;;  %p2648_p1 = scmp.lt.u32.totalorder %s2644_s21, %s3265_s1 }
   0x7   :  { %p2650_p2 = pnand %p2648_p1, %p2645_p0 }
   0x9   :  { %2653 = shalt.err (!%p2650_p2)
}
   0xa   :  { %s2654_s26 = scalar_lea.vmem %s31_s16, 512  ;;  %p2659_p4 = scmp.lt.s32.totalorder %s31_s16, %s31_s16 }
   0xb   :  { %p2655_p3 = scmp.ne.s32.totalorder %s31_s16, %s2654_s26  ;;  %p2660_p5 = scmp.lt.s32.totalorder %s2654_s26, %s2654_s26 }
   0xd   :  { %p2661_p6 = por %p2660_p5, %p2659_p4 }
   0xf   :  { %p2662_p7 = pnand %p2661_p6, %p2655_p3 }
  0x11   :  { %2665 = shalt.err (!%p2662_p7)
}
  0x12   :  { %33 = dma.hbm_to_vmem [thread:$0]  %s3265_s1, 512, %s31_s16, [#allocation9]  }
  0x13   :  { %s2666_s5 = scalar_lea.hbm %s3264_s0, 1024 }
  0x14   :  { %p2667_p8 = scmp.ne.s32.totalorder %s3264_s0, %s2666_s5  ;;  %p2670_p9 = scmp.lt.u32.totalorder %s2666_s5, %s3264_s0 }
  0x16   :  { %p2672_p10 = pnand %p2670_p9, %p2667_p8 }
  0x18   :  { %2675 = shalt.err (!%p2672_p10)
}
  0x19   :  { %s2676_s10 = scalar_lea.vmem %s2772_s18, 1024  ;;  %p2681_p12 = scmp.lt.s32.totalorder %s2772_s18, %s2772_s18 }
  0x1a   :  { %p2677_p11 = scmp.ne.s32.totalorder %s2772_s18, %s2676_s10  ;;  %p2682_p13 = scmp.lt.s32.totalorder %s2676_s10, %s2676_s10 }
  0x1c   :  { %p2683_p0 = por %p2682_p13, %p2681_p12 }
  0x1e   :  { %p2684_p1 = pnand %p2683_p0, %p2677_p11 }
  0x20   :  { %2687 = shalt.err (!%p2684_p1)
}
  0x21   :  { %s2740_s1 = smov 128   ;;  %s2741_s11 = smov 8  }
  0x22   :  { %23 = dma.hbm_to_vmem [thread:$0]  %s3264_s0, 1024, %s2772_s18, [#allocation6], %s2740_s1, %s2740_s1, %s2741_s11  }
  0x23   :  { %s2742_s14 = smov [#allocation10]   ;;  %s2688_s19 = scalar_lea.hbm %s3266_s2, 8192 }
  0x24   :  { %s39_s15 = sshll.u32 %s2742_s14, 4  ;;  %p2689_p2 = scmp.ne.s32.totalorder %s3266_s2, %s2688_s19  ;;  %s40_s15 = int_to_ptr.vmem [resolvable:$true] %s39_s15 }
  0x25   :  { %p2692_p3 = scmp.lt.u32.totalorder %s2688_s19, %s3266_s2 }
  0x27   :  { %p2694_p4 = pnand %p2692_p3, %p2689_p2 }
  0x29   :  { %2697 = shalt.err (!%p2694_p4)
}
  0x2a   :  { %s2698_s24 = scalar_lea.vmem %s40_s15, 8192  ;;  %p2703_p6 = scmp.lt.s32.totalorder %s40_s15, %s40_s15 }
  0x2b   :  { %p2699_p5 = scmp.ne.s32.totalorder %s40_s15, %s2698_s24  ;;  %p2704_p7 = scmp.lt.s32.totalorder %s2698_s24, %s2698_s24 }
  0x2d   :  { %p2705_p8 = por %p2704_p7, %p2703_p6 }
  0x2f   :  { %p2706_p9 = pnand %p2705_p8, %p2699_p5 }
  0x31   :  { %2709 = shalt.err (!%p2706_p9)
}
  0x32   :  { %s2743_s0 = smov 512   ;;  %s2744_s18 = smov 32  }
  0x33   :  { %45 = dma.hbm_to_vmem [thread:$0]  %s3266_s2, 8192, %s40_s15, [#allocation9], %s2743_s0, %s2743_s0, %s2744_s18  }
  0x34   :  { %2732 = dma.done.wait [#allocation6], 1024  }
  0x35   :  { %2733 = vsyncadd [#allocation6], 4294966272 }
  0x36   :  { %2734 = dma.done.wait [#allocation9], 8704  }
  0x37   :  { %2735 = vsyncadd [#allocation9], 4294958592  ;;  %v2745_v0 = vmov 0.0   ;;  %v72_v1 = vld [vmem:[#allocation8 + $0x8] sm:$0xff]  ;;  %v74_v2 = vld [vmem:[#allocation8 + $0x18] sm:$0xff]  ;;  %vm97_vm0 = vcmask 64512  }
  0x38   :  { %186 = vmatprep.mubr.f32.mxu0 %v2745_v0  ;;  %299 = vmatprep.mubr.f32.mxu1 %v2745_v0  ;;  %v71_v3 = vld [vmem:[#allocation8] sm:$0xff]  ;;  %v73_v4 = vld [vmem:[#allocation8 + $0x10] sm:$0xff]  ;;  %v381_v6 = vld [vmem:[#allocation10 + $0x8] sm:$0xff] }
  0x39   :  { %122 = vmatprep.subr.mxu0 %v72_v1  ;;  %235 = vmatprep.subr.mxu1 %v74_v2  ;;  %v63_v5 = vld [vmem:[#allocation5] sm:$0xff]  ;;  %v385_v7 = vld [vmem:[#allocation10 + $0x28] sm:$0xff]  ;;  %v383_v8 = vld [vmem:[#allocation10 + $0x18] sm:$0xff] }
  0x3a   :  { %123 = vmatpush1.msra.mxu0 %v71_v3  ;;  %236 = vmatpush1.msra.mxu1 %v73_v4  ;;  %v387_v9 = vld [vmem:[#allocation10 + $0x38] sm:$0xff]  ;;  %v2819_v10 = vpack.c.bf16 %v385_v7, %v381_v6  ;;  %v380_v12 = vld [vmem:[#allocation10] sm:$0xff]  ;;  %v382_v14 = vld [vmem:[#allocation10 + $0x10] sm:$0xff] }
  0x3b   :  { %1891 = vmatmul.mubr.msk.f32.vlgmr.msra.gmra.mrb[0].mxu0 %vm97_vm0, %v63_v5  ;;  %1899 = vmatmul.mubr.msk.f32.vlgmr.msra.gmra.mrb[0].mxu1 %vm97_vm0, %v63_v5  ;;  %v2821_v11 = vpack.c.bf16 %v387_v9, %v383_v8  ;;  %v384_v13 = vld [vmem:[#allocation10 + $0x20] sm:$0xff]  ;;  %v386_v16 = vld [vmem:[#allocation10 + $0x30] sm:$0xff]  ;;  %v64_v17 = vld [vmem:[#allocation5 + $0x8] sm:$0xff] }
  0x3c   :  { %v2823_v15 = vpack.c.bf16 %v384_v13, %v380_v12  ;;  %192 = vmatprep.mubr.f32.mxu0 %v2745_v0  ;;  %305 = vmatprep.mubr.f32.mxu1 %v2745_v0  ;;  %v389_v18 = vld [vmem:[#allocation10 + $0x48] sm:$0xff]  ;;  %v2829_v19 = vpack.c.bf16 %v386_v16, %v382_v14  ;;  %v391_v21 = vld [vmem:[#allocation10 + $0x58] sm:$0xff]  ;;  %v388_v25 = vld [vmem:[#allocation10 + $0x40] sm:$0xff] }
  0x3d   :  { %1932 = vmatprep.subr.bf16.mxu0 %v2819_v10  ;;  %1964 = vmatprep.subr.bf16.mxu1 %v2821_v11  ;;  %v393_v20 = vld [vmem:[#allocation10 + $0x68] sm:$0xff]  ;;  %v395_v22 = vld [vmem:[#allocation10 + $0x78] sm:$0xff]  ;;  %v392_v26 = vld [vmem:[#allocation10 + $0x60] sm:$0xff] }
  0x3e   :  { %1934 = vmatpush1.bf16.msra.mxu0 %v2823_v15  ;;  %v2832_v23 = vpack.c.bf16 %v393_v20, %v389_v18  ;;  %v2834_v24 = vpack.c.bf16 %v395_v22, %v391_v21  ;;  %v390_v27 = vld [vmem:[#allocation10 + $0x50] sm:$0xff]  ;;  %1966 = vmatpush1.bf16.msra.mxu1 %v2829_v19  ;;  %v2838_v28 = vpack.c.bf16 %v392_v26, %v388_v25  ;;  %v397_v31 = vld [vmem:[#allocation10 + $0x88] sm:$0xff]  ;;  %v399_v34 = vld [vmem:[#allocation10 + $0x98] sm:$0xff] }
  0x3f   :  { %1892 = vmatmul.mubr.msk.f32.gmra.mrb[2].mxu0 %vm97_vm0, %v64_v17  ;;  %v394_v29 = vld [vmem:[#allocation10 + $0x70] sm:$0xff]  ;;  %1900 = vmatmul.mubr.msk.f32.gmra.mrb[2].mxu1 %vm97_vm0, %v64_v17  ;;  %v401_v33 = vld [vmem:[#allocation10 + $0xa8] sm:$0xff]  ;;  %v403_v35 = vld [vmem:[#allocation10 + $0xb8] sm:$0xff] }
  0x40   :  { %v65_v30 = vld [vmem:[#allocation5 + $0x10] sm:$0xff]  ;;  %1936 = vmatprep.subr.bf16.mxu0 %v2832_v23  ;;  %v2842_v32 = vpack.c.bf16 %v394_v29, %v390_v27  ;;  %1968 = vmatprep.subr.bf16.mxu1 %v2834_v24  ;;  %v2846_v36 = vpack.c.bf16 %v401_v33, %v397_v31  ;;  %v2848_v37 = vpack.c.bf16 %v403_v35, %v399_v34  ;;  %v396_v38 = vld [vmem:[#allocation10 + $0x80] sm:$0xff]  ;;  %v66_v43 = vld [vmem:[#allocation5 + $0x18] sm:$0xff] }
  0x41   :  { %198 = vmatprep.mubr.f32.mxu0 %v2745_v0  ;;  %v400_v39 = vld [vmem:[#allocation10 + $0xa0] sm:$0xff]  ;;  %v398_v40 = vld [vmem:[#allocation10 + $0x90] sm:$0xff]  ;;  %311 = vmatprep.mubr.f32.mxu1 %v2745_v0  ;;  %v405_v44 = vld [vmem:[#allocation10 + $0xc8] sm:$0xff] }
  0x42   :  { %1938 = vmatpush1.bf16.msra.mxu0 %v2838_v28  ;;  %v2852_v41 = vpack.c.bf16 %v400_v39, %v396_v38  ;;  %v402_v42 = vld [vmem:[#allocation10 + $0xb0] sm:$0xff]  ;;  %1970 = vmatpush1.bf16.msra.mxu1 %v2842_v32  ;;  %v409_v46 = vld [vmem:[#allocation10 + $0xe8] sm:$0xff]  ;;  %v407_v47 = vld [vmem:[#allocation10 + $0xd8] sm:$0xff] }
  0x43   :  { %1893 = vmatmul.mubr.msk.f32.gmra.mrb[4].mxu0 %vm97_vm0, %v65_v30  ;;  %v2856_v45 = vpack.c.bf16 %v402_v42, %v398_v40  ;;  %v411_v48 = vld [vmem:[#allocation10 + $0xf8] sm:$0xff]  ;;  %1901 = vmatmul.mubr.msk.f32.gmra.mrb[4].mxu1 %vm97_vm0, %v65_v30  ;;  %v2860_v49 = vpack.c.bf16 %v409_v46, %v405_v44  ;;  %v404_v50 = vld [vmem:[#allocation10 + $0xc0] sm:$0xff]  ;;  %v406_v52 = vld [vmem:[#allocation10 + $0xd0] sm:$0xff] }
  0x44   :  { %1940 = vmatprep.subr.bf16.mxu0 %v2846_v36  ;;  %v408_v51 = vld [vmem:[#allocation10 + $0xe0] sm:$0xff]  ;;  %1972 = vmatprep.subr.bf16.mxu1 %v2848_v37  ;;  %v2864_v53 = vpack.c.bf16 %v411_v48, %v407_v47  ;;  %v410_v54 = vld [vmem:[#allocation10 + $0xf0] sm:$0xff]  ;;  %v413_v55 = vld [vmem:[#allocation10 + $0x108] sm:$0xff] }
  0x45   :  { %204 = vmatprep.mubr.f32.mxu0 %v2745_v0  ;;  %317 = vmatprep.mubr.f32.mxu1 %v2745_v0  ;;  %v2868_v56 = vpack.c.bf16 %v408_v51, %v404_v50  ;;  %v417_v57 = vld [vmem:[#allocation10 + $0x128] sm:$0xff]  ;;  %v415_v58 = vld [vmem:[#allocation10 + $0x118] sm:$0xff]  ;;  %v2872_v60 = vpack.c.bf16 %v410_v54, %v406_v52  ;;  %v412_v61 = vld [vmem:[#allocation10 + $0x100] sm:$0xff] }
  0x46   :  { %1942 = vmatpush1.bf16.msra.mxu0 %v2852_v41  ;;  %v419_v59 = vld [vmem:[#allocation10 + $0x138] sm:$0xff]  ;;  %1974 = vmatpush1.bf16.msra.mxu1 %v2856_v45  ;;  %v416_v62 = vld [vmem:[#allocation10 + $0x120] sm:$0xff]  ;;  %v2876_v1 = vpack.c.bf16 %v417_v57, %v413_v55  ;;  %v414_v2 = vld [vmem:[#allocation10 + $0x110] sm:$0xff] }
  0x47   :  { %1894 = vmatmul.mubr.msk.f32.gmra.mrb[6].mxu0 %vm97_vm0, %v66_v43  ;;  %1902 = vmatmul.mubr.msk.f32.gmra.mrb[6].mxu1 %vm97_vm0, %v66_v43  ;;  %v67_v63 = vld [vmem:[#allocation5 + $0x20] sm:$0xff]  ;;  %v418_v3 = vld [vmem:[#allocation10 + $0x130] sm:$0xff]  ;;  %v2880_v4 = vpack.c.bf16 %v419_v59, %v415_v58  ;;  %v421_v5 = vld [vmem:[#allocation10 + $0x148] sm:$0xff]  ;;  %v2884_v7 = vpack.c.bf16 %v416_v62, %v412_v61  ;;  %v77_v62 = vlaneseq }
  0x48   :  { %1944 = vmatprep.subr.bf16.mxu0 %v2860_v49  ;;  %1976 = vmatprep.subr.bf16.mxu1 %v2864_v53  ;;  %v425_v6 = vld [vmem:[#allocation10 + $0x168] sm:$0xff]  ;;  %v423_v8 = vld [vmem:[#allocation10 + $0x158] sm:$0xff]  ;;  %v2888_v12 = vpack.c.bf16 %v418_v3, %v414_v2  ;;  %v420_v13 = vld [vmem:[#allocation10 + $0x140] sm:$0xff] }
  0x49   :  { %210 = vmatprep.mubr.f32.mxu0 %v2745_v0  ;;  %323 = vmatprep.mubr.f32.mxu1 %v2745_v0  ;;  %v427_v9 = vld [vmem:[#allocation10 + $0x178] sm:$0xff]  ;;  %v424_v14 = vld [vmem:[#allocation10 + $0x160] sm:$0xff]  ;;  %v68_v16 = vld [vmem:[#allocation5 + $0x28] sm:$0xff]  ;;  %v2892_v17 = vpack.c.bf16 %v425_v6, %v421_v5 }
  0x4a   :  { %1946 = vmatpush1.bf16.msra.mxu0 %v2868_v56  ;;  %1978 = vmatpush1.bf16.msra.mxu1 %v2872_v60  ;;  %v422_v18 = vld [vmem:[#allocation10 + $0x150] sm:$0xff]  ;;  %v2896_v21 = vpack.c.bf16 %v427_v9, %v423_v8  ;;  %v429_v22 = vld [vmem:[#allocation10 + $0x188] sm:$0xff]  ;;  %v2900_v26 = vpack.c.bf16 %v424_v14, %v420_v13  ;;  %v431_v27 = vld [vmem:[#allocation10 + $0x198] sm:$0xff] }
  0x4b   :  { %1895 = vmatmul.mubr.msk.f32.gmra.mrb[8].mxu0 %vm97_vm0, %v67_v63  ;;  %1903 = vmatmul.mubr.msk.f32.gmra.mrb[8].mxu1 %vm97_vm0, %v67_v63  ;;  %v426_v20 = vld [vmem:[#allocation10 + $0x170] sm:$0xff]  ;;  %v433_v25 = vld [vmem:[#allocation10 + $0x1a8] sm:$0xff]  ;;  %v435_v29 = vld [vmem:[#allocation10 + $0x1b8] sm:$0xff]  ;;  %v78_v63 = vshrl.u32 %v77_v62, 7 }
  0x4c   :  { %1948 = vmatprep.subr.bf16.mxu0 %v2876_v1  ;;  %1980 = vmatprep.subr.bf16.mxu1 %v2880_v4  ;;  %v2904_v30 = vpack.c.bf16 %v426_v20, %v422_v18  ;;  %v428_v31 = vld [vmem:[#allocation10 + $0x180] sm:$0xff]  ;;  %v69_v34 = vld [vmem:[#allocation5 + $0x30] sm:$0xff]  ;;  %v2908_v35 = vpack.c.bf16 %v433_v25, %v429_v22  ;;  %v2912_v40 = vpack.c.bf16 %v435_v29, %v431_v27  ;;  %v437_v42 = vld [vmem:[#allocation10 + $0x1c8] sm:$0xff] }
  0x4d   :  { %216 = vmatprep.mubr.f32.mxu0 %v2745_v0  ;;  %329 = vmatprep.mubr.f32.mxu1 %v2745_v0  ;;  %v432_v33 = vld [vmem:[#allocation10 + $0x1a0] sm:$0xff]  ;;  %v430_v38 = vld [vmem:[#allocation10 + $0x190] sm:$0xff]  ;;  %v441_v43 = vld [vmem:[#allocation10 + $0x1e8] sm:$0xff]  ;;  %v79_v2 = vsub.s32 0, %v78_v63  ;;  %v83_v5 = vsub.s32 1, %v78_v63  ;;  %v91_v13 = vsub.s32 3, %v78_v63 }
  0x4e   :  { %1950 = vmatpush1.bf16.msra.mxu0 %v2884_v7  ;;  %1982 = vmatpush1.bf16.msra.mxu1 %v2888_v12  ;;  %v434_v39 = vld [vmem:[#allocation10 + $0x1b0] sm:$0xff]  ;;  %v2916_v44 = vpack.c.bf16 %v432_v33, %v428_v31  ;;  %v439_v46 = vld [vmem:[#allocation10 + $0x1d8] sm:$0xff]  ;;  %v436_v50 = vld [vmem:[#allocation10 + $0x1c0] sm:$0xff]  ;;  %v2924_v54 = vpack.c.bf16 %v441_v43, %v437_v42  ;;  %v87_v31 = vsub.s32 2, %v78_v63 }
  0x4f   :  { %1896 = vmatmul.mubr.msk.f32.gmra.mrb[10].mxu0 %vm97_vm0, %v68_v16  ;;  %1904 = vmatmul.mubr.msk.f32.gmra.mrb[10].mxu1 %vm97_vm0, %v68_v16  ;;  %v443_v47 = vld [vmem:[#allocation10 + $0x1f8] sm:$0xff]  ;;  %v2920_v48 = vpack.c.bf16 %v434_v39, %v430_v38  ;;  %v440_v51 = vld [vmem:[#allocation10 + $0x1e0] sm:$0xff]  ;;  %v438_v55 = vld [vmem:[#allocation10 + $0x1d0] sm:$0xff] }
  0x50   :  { %1952 = vmatprep.subr.bf16.mxu0 %v2892_v17  ;;  %1984 = vmatprep.subr.bf16.mxu1 %v2896_v21  ;;  %v70_v52 = vld [vmem:[#allocation5 + $0x38] sm:$0xff]  ;;  %v442_v57 = vld [vmem:[#allocation10 + $0x1f0] sm:$0xff]  ;;  %v2928_v58 = vpack.c.bf16 %v443_v47, %v439_v46  ;;  %v2932_v59 = vpack.c.bf16 %v440_v51, %v436_v50  ;;  %v75_v3 = vld [vmem:[%s3267_s3] sm:$0xf]  ;;  %s2746_s3 = smov [#allocation11]  }
  0x51   :  { %222 = vmatprep.mubr.f32.mxu0 %v2745_v0  ;;  %335 = vmatprep.mubr.f32.mxu1 %v2745_v0  ;;  %v2936_v61 = vpack.c.bf16 %v442_v57, %v438_v55  ;;  %v2986_v6 = vrot.slane %v75_v3, %v79_v2  ;;  %v2988_v8 = vrot.slane %v75_v3, %v83_v5  ;;  %s1874_s28 = sshll.u32 %s2746_s3, 4  ;;  %s1875_s28 = int_to_ptr.vmem [resolvable:$true] %s1874_s28 }
  0x52   :  { %1954 = vmatpush1.bf16.msra.mxu0 %v2900_v26  ;;  %1986 = vmatpush1.bf16.msra.mxu1 %v2904_v30  ;;  %v2992_v29 = vrot.slane %v75_v3, %v91_v13  ;;  %s2710_s29 = scalar_lea.vmem %s1875_s28, 128  ;;  %p2715_p11 = scmp.lt.s32.totalorder %s1875_s28, %s1875_s28 }
  0x53   :  { %1897 = vmatmul.mubr.msk.f32.gmra.mrb[12].mxu0 %vm97_vm0, %v69_v34  ;;  %1905 = vmatmul.mubr.msk.f32.gmra.mrb[12].mxu1 %vm97_vm0, %v69_v34  ;;  %v2995_v34 = vrot.slane %v75_v3, %v87_v31  ;;  %p2711_p10 = scmp.ne.s32.totalorder %s1875_s28, %s2710_s29  ;;  %p2716_p12 = scmp.lt.s32.totalorder %s2710_s29, %s2710_s29 }
  0x54   :  { %1956 = vmatprep.subr.bf16.mxu0 %v2908_v35  ;;  %1988 = vmatprep.subr.bf16.mxu1 %v2912_v40 }
  0x55   :  { %228 = vmatprep.mubr.f32.mxu0 %v2745_v0  ;;  %341 = vmatprep.mubr.f32.mxu1 %v2745_v0  ;;  %p2717_p13 = por %p2716_p12, %p2715_p11 }
  0x56   :  { %1958 = vmatpush1.bf16.msra.mxu0 %v2916_v44  ;;  %1990 = vmatpush1.bf16.msra.mxu1 %v2920_v48 }
  0x57   :  { %1898 = vmatmul.mubr.msk.f32.gmra.mrb[14].mxu0 %vm97_vm0, %v70_v52  ;;  %1906 = vmatmul.mubr.msk.f32.gmra.mrb[14].mxu1 %vm97_vm0, %v70_v52  ;;  %p2718_p0 = pnand %p2717_p13, %p2711_p10 }
  0x58   :  { %1960 = vmatprep.subr.bf16.mxu0 %v2924_v54  ;;  %1992 = vmatprep.subr.bf16.mxu1 %v2928_v58 }
  0x59   :  { %517 = vmatprep.mubr.f32.mxu0 %v2745_v0  ;;  %588 = vmatprep.mubr.f32.mxu1 %v2745_v0 }
  0x5a   :  { %1962 = vmatpush1.bf16.msra.mxu0 %v2932_v59  ;;  %1994 = vmatpush1.bf16.msra.mxu1 %v2936_v61 }
  0x5b   :  { %1996 = vmatprep.subr.bf16.mxu0 %v2819_v10  ;;  %2028 = vmatprep.subr.bf16.mxu1 %v2821_v11 }
  0x5d   :  { %518 = vmatmul.mubr.f32.vlgmr.msra.gmra.mrb[0].mxu0 %v2745_v0  ;;  %589 = vmatmul.mubr.f32.vlgmr.msra.gmra.mrb[0].mxu1 %v2745_v0 }
  0x5e   :  { %1998 = vmatpush1.bf16.msra.mxu0 %v2823_v15  ;;  %2030 = vmatpush1.bf16.msra.mxu1 %v2829_v19 }
  0x5f   :  { %2000 = vmatprep.subr.bf16.mxu0 %v2832_v23  ;;  %2032 = vmatprep.subr.bf16.mxu1 %v2834_v24 }
  0x60   :  { %694 = vmatprep.mubr.f32.mxu0 %v2745_v0  ;;  %765 = vmatprep.mubr.f32.mxu1 %v2745_v0 }
  0x62   :  { %2002 = vmatpush1.bf16.msra.mxu0 %v2838_v28  ;;  %2034 = vmatpush1.bf16.msra.mxu1 %v2842_v32 }
  0x63   :  { %2004 = vmatprep.subr.bf16.mxu0 %v2846_v36  ;;  %2036 = vmatprep.subr.bf16.mxu1 %v2848_v37 }
  0x66   :  { %2006 = vmatpush1.bf16.msra.mxu0 %v2852_v41  ;;  %2038 = vmatpush1.bf16.msra.mxu1 %v2856_v45 }
  0x67   :  { %2008 = vmatprep.subr.bf16.mxu0 %v2860_v49  ;;  %2040 = vmatprep.subr.bf16.mxu1 %v2864_v53 }
  0x6a   :  { %2010 = vmatpush1.bf16.msra.mxu0 %v2868_v56  ;;  %2042 = vmatpush1.bf16.msra.mxu1 %v2872_v60 }
  0x6b   :  { %2012 = vmatprep.subr.bf16.mxu0 %v2876_v1  ;;  %2044 = vmatprep.subr.bf16.mxu1 %v2880_v4 }
  0x6e   :  { %2014 = vmatpush1.bf16.msra.mxu0 %v2884_v7  ;;  %2046 = vmatpush1.bf16.msra.mxu1 %v2888_v12 }
  0x6f   :  { %2016 = vmatprep.subr.bf16.mxu0 %v2892_v17  ;;  %2048 = vmatprep.subr.bf16.mxu1 %v2896_v21 }
  0x72   :  { %2018 = vmatpush1.bf16.msra.mxu0 %v2900_v26  ;;  %2050 = vmatpush1.bf16.msra.mxu1 %v2904_v30 }
  0x73   :  { %2020 = vmatprep.subr.bf16.mxu0 %v2908_v35  ;;  %2052 = vmatprep.subr.bf16.mxu1 %v2912_v40 }
  0x76   :  { %2022 = vmatpush1.bf16.msra.mxu0 %v2916_v44  ;;  %2054 = vmatpush1.bf16.msra.mxu1 %v2920_v48 }
  0x77   :  { %2024 = vmatprep.subr.bf16.mxu0 %v2924_v54  ;;  %2056 = vmatprep.subr.bf16.mxu1 %v2928_v58 }
  0x7a   :  { %2026 = vmatpush1.bf16.msra.mxu0 %v2932_v59  ;;  %2058 = vmatpush1.bf16.msra.mxu1 %v2936_v61 }
  0x7b   :  { %2060 = vmatprep.subr.bf16.mxu0 %v2819_v10  ;;  %2092 = vmatprep.subr.bf16.mxu1 %v2821_v11 }
 0x130   :  { %v519_v9 = vpop.f32.mrb[0].mxu0  ;;  %v590_v16 = vpop.f32.mrb[0].mxu1 }
 0x131   :  { %v2443_v14 = vadd.f32 %v519_v9, %v2986_v6  ;;  %v521_v18 = vpop.f32.mrb[1].mxu0  ;;  %v592_v22 = vpop.f32.mrb[1].mxu1  ;;  %v2459_v39 = vadd.f32 %v590_v16, %v2995_v34 }
 0x132   :  { %v2444_v20 = vadd.f32 %v521_v18, %v2988_v8  ;;  %v2460_v33 = vadd.f32 %v592_v22, %v2992_v29 }
 0x133   :  { %v1907_v25 = vmul.f32 -1.442695, %v2443_v14 }
 0x134   :  { %v1908_v27 = vmul.f32 -1.442695, %v2444_v20  ;;  %v1909_v38 = vmul.f32 -1.442695, %v2460_v33 }
 0x135   :  { %2516 = vpow2.f32 %v1907_v25 }
 0x136   :  { %2518 = vpow2.f32 %v1908_v27 }
 0x137   :  { %2520 = vpow2.f32 %v1909_v38 }
 0x138   :  { %2522 = vtanh.f32 %v2459_v39 }
 0x13f   :  { %v2517_v42 = vpop.eup %2516 }
 0x140   :  { %v2519_v43 = vpop.eup %2518  ;;  %v602_v46 = vadd.f32 1.0, %v2517_v42 }
 0x141   :  { %v608_v47 = vadd.f32 1.0, %v2519_v43  ;;  %v2521_v50 = vpop.eup %2520 }
 0x142   :  { %2524 = vrcp.f32 %v602_v46  ;;  %v2523_v51 = vpop.eup %2522  ;;  %v615_v62 = vadd.f32 1.0, %v2521_v50 }
 0x143   :  { %2526 = vrcp.f32 %v608_v47 }
 0x144   :  { %2528 = vrcp.f32 %v615_v62 }
 0x14c   :  { %v2525_v52 = vpop.eup %2524 }
 0x14d   :  { %v2527_v55 = vpop.eup %2526  ;;  %v619_v57 = vmul.f32 %v2525_v52, %v2523_v51 }
 0x14e   :  { %v618_v63 = vmul.f32 0.0, %v2527_v55  ;;  %v2529_v3 = vpop.eup %2528 }
 0x150   :  { %v2998_v2 = vadd.f32 %v619_v57, %v618_v63 }
 0x152   :  { %2530 = vtanh.f32 %v2998_v2 }
 0x15c   :  { %v2531_v5 = vpop.eup %2530 }
 0x15d   :  { %v622_v9 = vmul.f32 %v2531_v5, %v2529_v3 }
 0x15f   :  { %695 = vmatmul.mubr.f32.vlgmr.msra.gmra.mrb[2].mxu0 %v622_v9  ;;  %766 = vmatmul.mubr.f32.vlgmr.msra.gmra.mrb[2].mxu1 %v622_v9 }
 0x160   :  { %2062 = vmatpush1.bf16.msra.mxu0 %v2823_v15  ;;  %2094 = vmatpush1.bf16.msra.mxu1 %v2829_v19 }
 0x161   :  { %2064 = vmatprep.subr.bf16.mxu0 %v2832_v23  ;;  %2096 = vmatprep.subr.bf16.mxu1 %v2834_v24 }
 0x162   :  { %871 = vmatprep.mubr.f32.mxu0 %v2745_v0  ;;  %942 = vmatprep.mubr.f32.mxu1 %v2745_v0 }
 0x164   :  { %2066 = vmatpush1.bf16.msra.mxu0 %v2838_v28  ;;  %2098 = vmatpush1.bf16.msra.mxu1 %v2842_v32 }
 0x165   :  { %2068 = vmatprep.subr.bf16.mxu0 %v2846_v36  ;;  %2100 = vmatprep.subr.bf16.mxu1 %v2848_v37 }
 0x168   :  { %2070 = vmatpush1.bf16.msra.mxu0 %v2852_v41  ;;  %2102 = vmatpush1.bf16.msra.mxu1 %v2856_v45 }
 0x169   :  { %2072 = vmatprep.subr.bf16.mxu0 %v2860_v49  ;;  %2104 = vmatprep.subr.bf16.mxu1 %v2864_v53 }
 0x16c   :  { %2074 = vmatpush1.bf16.msra.mxu0 %v2868_v56  ;;  %2106 = vmatpush1.bf16.msra.mxu1 %v2872_v60 }
 0x16d   :  { %2076 = vmatprep.subr.bf16.mxu0 %v2876_v1  ;;  %2108 = vmatprep.subr.bf16.mxu1 %v2880_v4 }
 0x170   :  { %2078 = vmatpush1.bf16.msra.mxu0 %v2884_v7  ;;  %2110 = vmatpush1.bf16.msra.mxu1 %v2888_v12 }
 0x171   :  { %2080 = vmatprep.subr.bf16.mxu0 %v2892_v17  ;;  %2112 = vmatprep.subr.bf16.mxu1 %v2896_v21 }
 0x174   :  { %2082 = vmatpush1.bf16.msra.mxu0 %v2900_v26  ;;  %2114 = vmatpush1.bf16.msra.mxu1 %v2904_v30 }
 0x175   :  { %2084 = vmatprep.subr.bf16.mxu0 %v2908_v35  ;;  %2116 = vmatprep.subr.bf16.mxu1 %v2912_v40 }
 0x178   :  { %2086 = vmatpush1.bf16.msra.mxu0 %v2916_v44  ;;  %2118 = vmatpush1.bf16.msra.mxu1 %v2920_v48 }
 0x179   :  { %2088 = vmatprep.subr.bf16.mxu0 %v2924_v54  ;;  %2120 = vmatprep.subr.bf16.mxu1 %v2928_v58 }
 0x17c   :  { %2090 = vmatpush1.bf16.msra.mxu0 %v2932_v59  ;;  %2122 = vmatpush1.bf16.msra.mxu1 %v2936_v61 }
 0x17d   :  { %2124 = vmatprep.subr.bf16.mxu0 %v2819_v10  ;;  %2156 = vmatprep.subr.bf16.mxu1 %v2821_v11 }
 0x232   :  { %v696_v13 = vpop.f32.mrb[2].mxu0  ;;  %v767_v14 = vpop.f32.mrb[2].mxu1 }
 0x233   :  { %v2445_v16 = vadd.f32 %v696_v13, %v2986_v6  ;;  %v698_v18 = vpop.f32.mrb[3].mxu0  ;;  %v769_v20 = vpop.f32.mrb[3].mxu1  ;;  %v2461_v38 = vadd.f32 %v767_v14, %v2995_v34 }
 0x234   :  { %v2446_v22 = vadd.f32 %v698_v18, %v2988_v8  ;;  %v2462_v31 = vadd.f32 %v769_v20, %v2992_v29 }
 0x235   :  { %v1910_v25 = vmul.f32 -1.442695, %v2445_v16 }
 0x236   :  { %v1911_v27 = vmul.f32 -1.442695, %v2446_v22  ;;  %v1912_v33 = vmul.f32 -1.442695, %v2462_v31 }
 0x237   :  { %2532 = vpow2.f32 %v1910_v25 }
 0x238   :  { %2534 = vpow2.f32 %v1911_v27 }
 0x239   :  { %2536 = vpow2.f32 %v1912_v33 }
 0x23a   :  { %2538 = vtanh.f32 %v2461_v38 }
 0x241   :  { %v2533_v39 = vpop.eup %2532 }
 0x242   :  { %v2535_v42 = vpop.eup %2534  ;;  %v779_v43 = vadd.f32 1.0, %v2533_v39 }
 0x243   :  { %v785_v46 = vadd.f32 1.0, %v2535_v42  ;;  %v2537_v47 = vpop.eup %2536 }
 0x244   :  { %2540 = vrcp.f32 %v779_v43  ;;  %v2539_v50 = vpop.eup %2538  ;;  %v792_v57 = vadd.f32 1.0, %v2537_v47 }
 0x245   :  { %2542 = vrcp.f32 %v785_v46 }
 0x246   :  { %2544 = vrcp.f32 %v792_v57 }
 0x24e   :  { %v2541_v51 = vpop.eup %2540 }
 0x24f   :  { %v2543_v52 = vpop.eup %2542  ;;  %v796_v55 = vmul.f32 %v2541_v51, %v2539_v50 }
 0x250   :  { %v795_v62 = vmul.f32 %v2543_v52, %v2998_v2  ;;  %v2545_v3 = vpop.eup %2544 }
 0x252   :  { %v3040_v63 = vadd.f32 %v796_v55, %v795_v62 }
 0x254   :  { %2546 = vtanh.f32 %v3040_v63 }
 0x25e   :  { %v2547_v5 = vpop.eup %2546 }
 0x25f   :  { %v799_v9 = vmul.f32 %v2547_v5, %v2545_v3 }
 0x261   :  { %872 = vmatmul.mubr.f32.vlgmr.msra.gmra.mrb[4].mxu0 %v799_v9  ;;  %943 = vmatmul.mubr.f32.vlgmr.msra.gmra.mrb[4].mxu1 %v799_v9 }
 0x262   :  { %2126 = vmatpush1.bf16.msra.mxu0 %v2823_v15  ;;  %2158 = vmatpush1.bf16.msra.mxu1 %v2829_v19 }
 0x263   :  { %2128 = vmatprep.subr.bf16.mxu0 %v2832_v23  ;;  %2160 = vmatprep.subr.bf16.mxu1 %v2834_v24 }
 0x264   :  { %1048 = vmatprep.mubr.f32.mxu0 %v2745_v0  ;;  %1119 = vmatprep.mubr.f32.mxu1 %v2745_v0 }
 0x266   :  { %2130 = vmatpush1.bf16.msra.mxu0 %v2838_v28  ;;  %2162 = vmatpush1.bf16.msra.mxu1 %v2842_v32 }
 0x267   :  { %2132 = vmatprep.subr.bf16.mxu0 %v2846_v36  ;;  %2164 = vmatprep.subr.bf16.mxu1 %v2848_v37 }
 0x26a   :  { %2134 = vmatpush1.bf16.msra.mxu0 %v2852_v41  ;;  %2166 = vmatpush1.bf16.msra.mxu1 %v2856_v45 }
 0x26b   :  { %2136 = vmatprep.subr.bf16.mxu0 %v2860_v49  ;;  %2168 = vmatprep.subr.bf16.mxu1 %v2864_v53 }
 0x26e   :  { %2138 = vmatpush1.bf16.msra.mxu0 %v2868_v56  ;;  %2170 = vmatpush1.bf16.msra.mxu1 %v2872_v60 }
 0x26f   :  { %2140 = vmatprep.subr.bf16.mxu0 %v2876_v1  ;;  %2172 = vmatprep.subr.bf16.mxu1 %v2880_v4 }
 0x272   :  { %2142 = vmatpush1.bf16.msra.mxu0 %v2884_v7  ;;  %2174 = vmatpush1.bf16.msra.mxu1 %v2888_v12 }
 0x273   :  { %2144 = vmatprep.subr.bf16.mxu0 %v2892_v17  ;;  %2176 = vmatprep.subr.bf16.mxu1 %v2896_v21 }
 0x276   :  { %2146 = vmatpush1.bf16.msra.mxu0 %v2900_v26  ;;  %2178 = vmatpush1.bf16.msra.mxu1 %v2904_v30 }
 0x277   :  { %2148 = vmatprep.subr.bf16.mxu0 %v2908_v35  ;;  %2180 = vmatprep.subr.bf16.mxu1 %v2912_v40 }
 0x27a   :  { %2150 = vmatpush1.bf16.msra.mxu0 %v2916_v44  ;;  %2182 = vmatpush1.bf16.msra.mxu1 %v2920_v48 }
 0x27b   :  { %2152 = vmatprep.subr.bf16.mxu0 %v2924_v54  ;;  %2184 = vmatprep.subr.bf16.mxu1 %v2928_v58 }
 0x27e   :  { %2154 = vmatpush1.bf16.msra.mxu0 %v2932_v59  ;;  %2186 = vmatpush1.bf16.msra.mxu1 %v2936_v61 }
 0x27f   :  { %2188 = vmatprep.subr.bf16.mxu0 %v2819_v10  ;;  %2220 = vmatprep.subr.bf16.mxu1 %v2821_v11 }
 0x334   :  { %v873_v2 = vpop.f32.mrb[4].mxu0  ;;  %v944_v13 = vpop.f32.mrb[4].mxu1 }
 0x335   :  { %v2447_v14 = vadd.f32 %v873_v2, %v2986_v6  ;;  %v875_v16 = vpop.f32.mrb[5].mxu0  ;;  %v946_v18 = vpop.f32.mrb[5].mxu1  ;;  %v2463_v33 = vadd.f32 %v944_v13, %v2995_v34 }
 0x336   :  { %v2448_v20 = vadd.f32 %v875_v16, %v2988_v8  ;;  %v2464_v27 = vadd.f32 %v946_v18, %v2992_v29 }
 0x337   :  { %v1913_v22 = vmul.f32 -1.442695, %v2447_v14 }
 0x338   :  { %v1914_v25 = vmul.f32 -1.442695, %v2448_v20  ;;  %v1915_v31 = vmul.f32 -1.442695, %v2464_v27 }
 0x339   :  { %2548 = vpow2.f32 %v1913_v22 }
 0x33a   :  { %2550 = vpow2.f32 %v1914_v25 }
 0x33b   :  { %2552 = vpow2.f32 %v1915_v31 }
 0x33c   :  { %2554 = vtanh.f32 %v2463_v33 }
 0x343   :  { %v2549_v38 = vpop.eup %2548 }
 0x344   :  { %v2551_v39 = vpop.eup %2550  ;;  %v956_v42 = vadd.f32 1.0, %v2549_v38 }
 0x345   :  { %v962_v43 = vadd.f32 1.0, %v2551_v39  ;;  %v2553_v46 = vpop.eup %2552 }
 0x346   :  { %2556 = vrcp.f32 %v956_v42  ;;  %v2555_v47 = vpop.eup %2554  ;;  %v969_v55 = vadd.f32 1.0, %v2553_v46 }
 0x347   :  { %2558 = vrcp.f32 %v962_v43 }
 0x348   :  { %2560 = vrcp.f32 %v969_v55 }
 0x350   :  { %v2557_v50 = vpop.eup %2556 }
 0x351   :  { %v2559_v51 = vpop.eup %2558  ;;  %v973_v52 = vmul.f32 %v2557_v50, %v2555_v47 }
 0x352   :  { %v972_v57 = vmul.f32 %v2559_v51, %v3040_v63  ;;  %v2561_v3 = vpop.eup %2560 }
 0x354   :  { %v3082_v62 = vadd.f32 %v973_v52, %v972_v57 }
 0x356   :  { %2562 = vtanh.f32 %v3082_v62 }
 0x360   :  { %v2563_v5 = vpop.eup %2562 }
 0x361   :  { %v976_v9 = vmul.f32 %v2563_v5, %v2561_v3 }
 0x363   :  { %1049 = vmatmul.mubr.f32.vlgmr.msra.gmra.mrb[6].mxu0 %v976_v9  ;;  %1120 = vmatmul.mubr.f32.vlgmr.msra.gmra.mrb[6].mxu1 %v976_v9 }
 0x364   :  { %2190 = vmatpush1.bf16.msra.mxu0 %v2823_v15  ;;  %2222 = vmatpush1.bf16.msra.mxu1 %v2829_v19 }
 0x365   :  { %2192 = vmatprep.subr.bf16.mxu0 %v2832_v23  ;;  %2224 = vmatprep.subr.bf16.mxu1 %v2834_v24 }
 0x366   :  { %1225 = vmatprep.mubr.f32.mxu0 %v2745_v0  ;;  %1296 = vmatprep.mubr.f32.mxu1 %v2745_v0 }
 0x368   :  { %2194 = vmatpush1.bf16.msra.mxu0 %v2838_v28  ;;  %2226 = vmatpush1.bf16.msra.mxu1 %v2842_v32 }
 0x369   :  { %2196 = vmatprep.subr.bf16.mxu0 %v2846_v36  ;;  %2228 = vmatprep.subr.bf16.mxu1 %v2848_v37 }
 0x36c   :  { %2198 = vmatpush1.bf16.msra.mxu0 %v2852_v41  ;;  %2230 = vmatpush1.bf16.msra.mxu1 %v2856_v45 }
 0x36d   :  { %2200 = vmatprep.subr.bf16.mxu0 %v2860_v49  ;;  %2232 = vmatprep.subr.bf16.mxu1 %v2864_v53 }
 0x370   :  { %2202 = vmatpush1.bf16.msra.mxu0 %v2868_v56  ;;  %2234 = vmatpush1.bf16.msra.mxu1 %v2872_v60 }
 0x371   :  { %2204 = vmatprep.subr.bf16.mxu0 %v2876_v1  ;;  %2236 = vmatprep.subr.bf16.mxu1 %v2880_v4 }
 0x374   :  { %2206 = vmatpush1.bf16.msra.mxu0 %v2884_v7  ;;  %2238 = vmatpush1.bf16.msra.mxu1 %v2888_v12 }
 0x375   :  { %2208 = vmatprep.subr.bf16.mxu0 %v2892_v17  ;;  %2240 = vmatprep.subr.bf16.mxu1 %v2896_v21 }
 0x378   :  { %2210 = vmatpush1.bf16.msra.mxu0 %v2900_v26  ;;  %2242 = vmatpush1.bf16.msra.mxu1 %v2904_v30 }
 0x379   :  { %2212 = vmatprep.subr.bf16.mxu0 %v2908_v35  ;;  %2244 = vmatprep.subr.bf16.mxu1 %v2912_v40 }
 0x37c   :  { %2214 = vmatpush1.bf16.msra.mxu0 %v2916_v44  ;;  %2246 = vmatpush1.bf16.msra.mxu1 %v2920_v48 }
 0x37d   :  { %2216 = vmatprep.subr.bf16.mxu0 %v2924_v54  ;;  %2248 = vmatprep.subr.bf16.mxu1 %v2928_v58 }
 0x380   :  { %2218 = vmatpush1.bf16.msra.mxu0 %v2932_v59  ;;  %2250 = vmatpush1.bf16.msra.mxu1 %v2936_v61 }
 0x381   :  { %2252 = vmatprep.subr.bf16.mxu0 %v2819_v10  ;;  %2284 = vmatprep.subr.bf16.mxu1 %v2821_v11 }
 0x436   :  { %v1050_v63 = vpop.f32.mrb[6].mxu0  ;;  %v1121_v2 = vpop.f32.mrb[6].mxu1 }
 0x437   :  { %v2449_v13 = vadd.f32 %v1050_v63, %v2986_v6  ;;  %v1052_v14 = vpop.f32.mrb[7].mxu0  ;;  %v1123_v16 = vpop.f32.mrb[7].mxu1  ;;  %v2465_v31 = vadd.f32 %v1121_v2, %v2995_v34 }
 0x438   :  { %v2450_v18 = vadd.f32 %v1052_v14, %v2988_v8  ;;  %v2466_v25 = vadd.f32 %v1123_v16, %v2992_v29 }
 0x439   :  { %v1916_v20 = vmul.f32 -1.442695, %v2449_v13 }
 0x43a   :  { %v1917_v22 = vmul.f32 -1.442695, %v2450_v18  ;;  %v1918_v27 = vmul.f32 -1.442695, %v2466_v25 }
 0x43b   :  { %2564 = vpow2.f32 %v1916_v20 }
 0x43c   :  { %2566 = vpow2.f32 %v1917_v22 }
 0x43d   :  { %2568 = vpow2.f32 %v1918_v27 }
 0x43e   :  { %2570 = vtanh.f32 %v2465_v31 }
 0x445   :  { %v2565_v33 = vpop.eup %2564 }
 0x446   :  { %v2567_v38 = vpop.eup %2566  ;;  %v1133_v39 = vadd.f32 1.0, %v2565_v33 }
 0x447   :  { %v1139_v42 = vadd.f32 1.0, %v2567_v38  ;;  %v2569_v43 = vpop.eup %2568 }
 0x448   :  { %2572 = vrcp.f32 %v1133_v39  ;;  %v2571_v46 = vpop.eup %2570  ;;  %v1146_v52 = vadd.f32 1.0, %v2569_v43 }
 0x449   :  { %2574 = vrcp.f32 %v1139_v42 }
 0x44a   :  { %2576 = vrcp.f32 %v1146_v52 }
 0x452   :  { %v2573_v47 = vpop.eup %2572 }
 0x453   :  { %v2575_v50 = vpop.eup %2574  ;;  %v1150_v51 = vmul.f32 %v2573_v47, %v2571_v46 }
 0x454   :  { %v1149_v55 = vmul.f32 %v2575_v50, %v3082_v62  ;;  %v2577_v3 = vpop.eup %2576 }
 0x456   :  { %v3124_v57 = vadd.f32 %v1150_v51, %v1149_v55 }
 0x458   :  { %2578 = vtanh.f32 %v3124_v57 }
 0x462   :  { %v2579_v5 = vpop.eup %2578 }
 0x463   :  { %v1153_v9 = vmul.f32 %v2579_v5, %v2577_v3 }
 0x465   :  { %1226 = vmatmul.mubr.f32.vlgmr.msra.gmra.mrb[8].mxu0 %v1153_v9  ;;  %1297 = vmatmul.mubr.f32.vlgmr.msra.gmra.mrb[8].mxu1 %v1153_v9 }
 0x466   :  { %2254 = vmatpush1.bf16.msra.mxu0 %v2823_v15  ;;  %2286 = vmatpush1.bf16.msra.mxu1 %v2829_v19 }
 0x467   :  { %2256 = vmatprep.subr.bf16.mxu0 %v2832_v23  ;;  %2288 = vmatprep.subr.bf16.mxu1 %v2834_v24 }
 0x468   :  { %1402 = vmatprep.mubr.f32.mxu0 %v2745_v0  ;;  %1473 = vmatprep.mubr.f32.mxu1 %v2745_v0 }
 0x46a   :  { %2258 = vmatpush1.bf16.msra.mxu0 %v2838_v28  ;;  %2290 = vmatpush1.bf16.msra.mxu1 %v2842_v32 }
 0x46b   :  { %2260 = vmatprep.subr.bf16.mxu0 %v2846_v36  ;;  %2292 = vmatprep.subr.bf16.mxu1 %v2848_v37 }
 0x46e   :  { %2262 = vmatpush1.bf16.msra.mxu0 %v2852_v41  ;;  %2294 = vmatpush1.bf16.msra.mxu1 %v2856_v45 }
 0x46f   :  { %2264 = vmatprep.subr.bf16.mxu0 %v2860_v49  ;;  %2296 = vmatprep.subr.bf16.mxu1 %v2864_v53 }
 0x472   :  { %2266 = vmatpush1.bf16.msra.mxu0 %v2868_v56  ;;  %2298 = vmatpush1.bf16.msra.mxu1 %v2872_v60 }
 0x473   :  { %2268 = vmatprep.subr.bf16.mxu0 %v2876_v1  ;;  %2300 = vmatprep.subr.bf16.mxu1 %v2880_v4 }
 0x476   :  { %2270 = vmatpush1.bf16.msra.mxu0 %v2884_v7  ;;  %2302 = vmatpush1.bf16.msra.mxu1 %v2888_v12 }
 0x477   :  { %2272 = vmatprep.subr.bf16.mxu0 %v2892_v17  ;;  %2304 = vmatprep.subr.bf16.mxu1 %v2896_v21 }
 0x47a   :  { %2274 = vmatpush1.bf16.msra.mxu0 %v2900_v26  ;;  %2306 = vmatpush1.bf16.msra.mxu1 %v2904_v30 }
 0x47b   :  { %2276 = vmatprep.subr.bf16.mxu0 %v2908_v35  ;;  %2308 = vmatprep.subr.bf16.mxu1 %v2912_v40 }
 0x47e   :  { %2278 = vmatpush1.bf16.msra.mxu0 %v2916_v44  ;;  %2310 = vmatpush1.bf16.msra.mxu1 %v2920_v48 }
 0x47f   :  { %2280 = vmatprep.subr.bf16.mxu0 %v2924_v54  ;;  %2312 = vmatprep.subr.bf16.mxu1 %v2928_v58 }
 0x482   :  { %2282 = vmatpush1.bf16.msra.mxu0 %v2932_v59  ;;  %2314 = vmatpush1.bf16.msra.mxu1 %v2936_v61 }
 0x483   :  { %2316 = vmatprep.subr.bf16.mxu0 %v2819_v10  ;;  %2348 = vmatprep.subr.bf16.mxu1 %v2821_v11 }
 0x538   :  { %v1227_v62 = vpop.f32.mrb[8].mxu0  ;;  %v1298_v63 = vpop.f32.mrb[8].mxu1 }
 0x539   :  { %v2451_v2 = vadd.f32 %v1227_v62, %v2986_v6  ;;  %v1229_v13 = vpop.f32.mrb[9].mxu0  ;;  %v1300_v14 = vpop.f32.mrb[9].mxu1  ;;  %v2467_v27 = vadd.f32 %v1298_v63, %v2995_v34 }
 0x53a   :  { %v2452_v16 = vadd.f32 %v1229_v13, %v2988_v8  ;;  %v2468_v22 = vadd.f32 %v1300_v14, %v2992_v29 }
 0x53b   :  { %v1919_v18 = vmul.f32 -1.442695, %v2451_v2 }
 0x53c   :  { %v1920_v20 = vmul.f32 -1.442695, %v2452_v16  ;;  %v1921_v25 = vmul.f32 -1.442695, %v2468_v22 }
 0x53d   :  { %2580 = vpow2.f32 %v1919_v18 }
 0x53e   :  { %2582 = vpow2.f32 %v1920_v20 }
 0x53f   :  { %2584 = vpow2.f32 %v1921_v25 }
 0x540   :  { %2586 = vtanh.f32 %v2467_v27 }
 0x547   :  { %v2581_v31 = vpop.eup %2580 }
 0x548   :  { %v2583_v33 = vpop.eup %2582  ;;  %v1310_v38 = vadd.f32 1.0, %v2581_v31 }
 0x549   :  { %v1316_v39 = vadd.f32 1.0, %v2583_v33  ;;  %v2585_v42 = vpop.eup %2584 }
 0x54a   :  { %2588 = vrcp.f32 %v1310_v38  ;;  %v2587_v43 = vpop.eup %2586  ;;  %v1323_v51 = vadd.f32 1.0, %v2585_v42 }
 0x54b   :  { %2590 = vrcp.f32 %v1316_v39 }
 0x54c   :  { %2592 = vrcp.f32 %v1323_v51 }
 0x554   :  { %v2589_v46 = vpop.eup %2588 }
 0x555   :  { %v2591_v47 = vpop.eup %2590  ;;  %v1327_v50 = vmul.f32 %v2589_v46, %v2587_v43 }
 0x556   :  { %v1326_v52 = vmul.f32 %v2591_v47, %v3124_v57  ;;  %v2593_v3 = vpop.eup %2592 }
 0x558   :  { %v3166_v55 = vadd.f32 %v1327_v50, %v1326_v52 }
 0x55a   :  { %2594 = vtanh.f32 %v3166_v55 }
 0x564   :  { %v2595_v5 = vpop.eup %2594 }
 0x565   :  { %v1330_v9 = vmul.f32 %v2595_v5, %v2593_v3 }
 0x567   :  { %1403 = vmatmul.mubr.f32.vlgmr.msra.gmra.mrb[10].mxu0 %v1330_v9  ;;  %1474 = vmatmul.mubr.f32.vlgmr.msra.gmra.mrb[10].mxu1 %v1330_v9 }
 0x568   :  { %2318 = vmatpush1.bf16.msra.mxu0 %v2823_v15  ;;  %2350 = vmatpush1.bf16.msra.mxu1 %v2829_v19 }
 0x569   :  { %2320 = vmatprep.subr.bf16.mxu0 %v2832_v23  ;;  %2352 = vmatprep.subr.bf16.mxu1 %v2834_v24 }
 0x56a   :  { %1579 = vmatprep.mubr.f32.mxu0 %v2745_v0  ;;  %1650 = vmatprep.mubr.f32.mxu1 %v2745_v0 }
 0x56c   :  { %2322 = vmatpush1.bf16.msra.mxu0 %v2838_v28  ;;  %2354 = vmatpush1.bf16.msra.mxu1 %v2842_v32 }
 0x56d   :  { %2324 = vmatprep.subr.bf16.mxu0 %v2846_v36  ;;  %2356 = vmatprep.subr.bf16.mxu1 %v2848_v37 }
 0x570   :  { %2326 = vmatpush1.bf16.msra.mxu0 %v2852_v41  ;;  %2358 = vmatpush1.bf16.msra.mxu1 %v2856_v45 }
 0x571   :  { %2328 = vmatprep.subr.bf16.mxu0 %v2860_v49  ;;  %2360 = vmatprep.subr.bf16.mxu1 %v2864_v53 }
 0x574   :  { %2330 = vmatpush1.bf16.msra.mxu0 %v2868_v56  ;;  %2362 = vmatpush1.bf16.msra.mxu1 %v2872_v60 }
 0x575   :  { %2332 = vmatprep.subr.bf16.mxu0 %v2876_v1  ;;  %2364 = vmatprep.subr.bf16.mxu1 %v2880_v4 }
 0x578   :  { %2334 = vmatpush1.bf16.msra.mxu0 %v2884_v7  ;;  %2366 = vmatpush1.bf16.msra.mxu1 %v2888_v12 }
 0x579   :  { %2336 = vmatprep.subr.bf16.mxu0 %v2892_v17  ;;  %2368 = vmatprep.subr.bf16.mxu1 %v2896_v21 }
 0x57c   :  { %2338 = vmatpush1.bf16.msra.mxu0 %v2900_v26  ;;  %2370 = vmatpush1.bf16.msra.mxu1 %v2904_v30 }
 0x57d   :  { %2340 = vmatprep.subr.bf16.mxu0 %v2908_v35  ;;  %2372 = vmatprep.subr.bf16.mxu1 %v2912_v40 }
 0x580   :  { %2342 = vmatpush1.bf16.msra.mxu0 %v2916_v44  ;;  %2374 = vmatpush1.bf16.msra.mxu1 %v2920_v48 }
 0x581   :  { %2344 = vmatprep.subr.bf16.mxu0 %v2924_v54  ;;  %2376 = vmatprep.subr.bf16.mxu1 %v2928_v58 }
 0x584   :  { %2346 = vmatpush1.bf16.msra.mxu0 %v2932_v59  ;;  %2378 = vmatpush1.bf16.msra.mxu1 %v2936_v61 }
 0x585   :  { %2380 = vmatprep.subr.bf16.mxu0 %v2819_v10  ;;  %2412 = vmatprep.subr.bf16.mxu1 %v2821_v11 }
 0x63a   :  { %v1404_v57 = vpop.f32.mrb[10].mxu0  ;;  %v1475_v62 = vpop.f32.mrb[10].mxu1 }
 0x63b   :  { %v2453_v63 = vadd.f32 %v1404_v57, %v2986_v6  ;;  %v1406_v2 = vpop.f32.mrb[11].mxu0  ;;  %v1477_v13 = vpop.f32.mrb[11].mxu1  ;;  %v2469_v25 = vadd.f32 %v1475_v62, %v2995_v34 }
 0x63c   :  { %v2454_v14 = vadd.f32 %v1406_v2, %v2988_v8  ;;  %v2470_v20 = vadd.f32 %v1477_v13, %v2992_v29 }
 0x63d   :  { %v1922_v16 = vmul.f32 -1.442695, %v2453_v63 }
 0x63e   :  { %v1923_v18 = vmul.f32 -1.442695, %v2454_v14  ;;  %v1924_v22 = vmul.f32 -1.442695, %v2470_v20 }
 0x63f   :  { %2596 = vpow2.f32 %v1922_v16 }
 0x640   :  { %2598 = vpow2.f32 %v1923_v18 }
 0x641   :  { %2600 = vpow2.f32 %v1924_v22 }
 0x642   :  { %2602 = vtanh.f32 %v2469_v25 }
 0x649   :  { %v2597_v10 = vpop.eup %2596 }
 0x64a   :  { %v2599_v27 = vpop.eup %2598  ;;  %v1487_v11 = vadd.f32 1.0, %v2597_v10 }
 0x64b   :  { %v1493_v31 = vadd.f32 1.0, %v2599_v27  ;;  %v2601_v33 = vpop.eup %2600 }
 0x64c   :  { %2604 = vrcp.f32 %v1487_v11  ;;  %v2603_v38 = vpop.eup %2602  ;;  %v1500_v46 = vadd.f32 1.0, %v2601_v33 }
 0x64d   :  { %2606 = vrcp.f32 %v1493_v31 }
 0x64e   :  { %2608 = vrcp.f32 %v1500_v46 }
 0x656   :  { %v2605_v39 = vpop.eup %2604 }
 0x657   :  { %v2607_v42 = vpop.eup %2606  ;;  %v1504_v43 = vmul.f32 %v2605_v39, %v2603_v38 }
 0x658   :  { %v1503_v47 = vmul.f32 %v2607_v42, %v3166_v55  ;;  %v2609_v51 = vpop.eup %2608 }
 0x65a   :  { %v3208_v50 = vadd.f32 %v1504_v43, %v1503_v47 }
 0x65c   :  { %2610 = vtanh.f32 %v3208_v50 }
 0x666   :  { %v2611_v52 = vpop.eup %2610 }
 0x667   :  { %v1507_v3 = vmul.f32 %v2611_v52, %v2609_v51 }
 0x669   :  { %1580 = vmatmul.mubr.f32.vlgmr.msra.gmra.mrb[12].mxu0 %v1507_v3  ;;  %1651 = vmatmul.mubr.f32.vlgmr.msra.gmra.mrb[12].mxu1 %v1507_v3 }
 0x66a   :  { %2382 = vmatpush1.bf16.msra.mxu0 %v2823_v15  ;;  %2414 = vmatpush1.bf16.msra.mxu1 %v2829_v19 }
 0x66b   :  { %2384 = vmatprep.subr.bf16.mxu0 %v2832_v23  ;;  %2416 = vmatprep.subr.bf16.mxu1 %v2834_v24 }
 0x66c   :  { %1756 = vmatprep.mubr.f32.mxu0 %v2745_v0  ;;  %1827 = vmatprep.mubr.f32.mxu1 %v2745_v0 }
 0x66e   :  { %2386 = vmatpush1.bf16.msra.mxu0 %v2838_v28  ;;  %2418 = vmatpush1.bf16.msra.mxu1 %v2842_v32 }
 0x66f   :  { %2388 = vmatprep.subr.bf16.mxu0 %v2846_v36  ;;  %2420 = vmatprep.subr.bf16.mxu1 %v2848_v37 }
 0x672   :  { %2390 = vmatpush1.bf16.msra.mxu0 %v2852_v41  ;;  %2422 = vmatpush1.bf16.msra.mxu1 %v2856_v45 }
 0x673   :  { %2392 = vmatprep.subr.bf16.mxu0 %v2860_v49  ;;  %2424 = vmatprep.subr.bf16.mxu1 %v2864_v53 }
 0x676   :  { %2394 = vmatpush1.bf16.msra.mxu0 %v2868_v56  ;;  %2426 = vmatpush1.bf16.msra.mxu1 %v2872_v60 }
 0x677   :  { %2396 = vmatprep.subr.bf16.mxu0 %v2876_v1  ;;  %2428 = vmatprep.subr.bf16.mxu1 %v2880_v4 }
 0x67a   :  { %2398 = vmatpush1.bf16.msra.mxu0 %v2884_v7  ;;  %2430 = vmatpush1.bf16.msra.mxu1 %v2888_v12 }
 0x67b   :  { %2400 = vmatprep.subr.bf16.mxu0 %v2892_v17  ;;  %2432 = vmatprep.subr.bf16.mxu1 %v2896_v21 }
 0x67e   :  { %2402 = vmatpush1.bf16.msra.mxu0 %v2900_v26  ;;  %2434 = vmatpush1.bf16.msra.mxu1 %v2904_v30 }
 0x67f   :  { %2404 = vmatprep.subr.bf16.mxu0 %v2908_v35  ;;  %2436 = vmatprep.subr.bf16.mxu1 %v2912_v40 }
 0x682   :  { %2406 = vmatpush1.bf16.msra.mxu0 %v2916_v44  ;;  %2438 = vmatpush1.bf16.msra.mxu1 %v2920_v48 }
 0x683   :  { %2408 = vmatprep.subr.bf16.mxu0 %v2924_v54  ;;  %2440 = vmatprep.subr.bf16.mxu1 %v2928_v58 }
 0x686   :  { %2410 = vmatpush1.bf16.msra.mxu0 %v2932_v59  ;;  %2442 = vmatpush1.bf16.msra.mxu1 %v2936_v61 }
 0x73c   :  { %v1581_v0 = vpop.f32.mrb[12].mxu0  ;;  %v1652_v15 = vpop.f32.mrb[12].mxu1 }
 0x73d   :  { %v2455_v19 = vadd.f32 %v1581_v0, %v2986_v6  ;;  %v1583_v23 = vpop.f32.mrb[13].mxu0  ;;  %v1654_v24 = vpop.f32.mrb[13].mxu1  ;;  %v2471_v45 = vadd.f32 %v1652_v15, %v2995_v34 }
 0x73e   :  { %v2456_v28 = vadd.f32 %v1583_v23, %v2988_v8  ;;  %v2472_v37 = vadd.f32 %v1654_v24, %v2992_v29 }
 0x73f   :  { %v1925_v32 = vmul.f32 -1.442695, %v2455_v19 }
 0x740   :  { %v1926_v36 = vmul.f32 -1.442695, %v2456_v28  ;;  %v1927_v41 = vmul.f32 -1.442695, %v2472_v37 }
 0x741   :  { %2612 = vpow2.f32 %v1925_v32 }
 0x742   :  { %2614 = vpow2.f32 %v1926_v36 }
 0x743   :  { %2616 = vpow2.f32 %v1927_v41 }
 0x744   :  { %2618 = vtanh.f32 %v2471_v45 }
 0x74b   :  { %v2613_v49 = vpop.eup %2612 }
 0x74c   :  { %v2615_v53 = vpop.eup %2614  ;;  %v1664_v56 = vadd.f32 1.0, %v2613_v49 }
 0x74d   :  { %v1670_v60 = vadd.f32 1.0, %v2615_v53  ;;  %v2617_v1 = vpop.eup %2616 }
 0x74e   :  { %2620 = vrcp.f32 %v1664_v56  ;;  %v2619_v4 = vpop.eup %2618  ;;  %v1677_v21 = vadd.f32 1.0, %v2617_v1 }
 0x74f   :  { %2622 = vrcp.f32 %v1670_v60 }
 0x750   :  { %2624 = vrcp.f32 %v1677_v21 }
 0x758   :  { %v2621_v7 = vpop.eup %2620 }
 0x759   :  { %v2623_v12 = vpop.eup %2622  ;;  %v1681_v17 = vmul.f32 %v2621_v7, %v2619_v4 }
 0x75a   :  { %v1680_v26 = vmul.f32 %v2623_v12, %v3208_v50  ;;  %v2625_v35 = vpop.eup %2624 }
 0x75c   :  { %v1682_v30 = vadd.f32 %v1681_v17, %v1680_v26 }
 0x75e   :  { %2626 = vtanh.f32 %v1682_v30 }
 0x768   :  { %v2627_v40 = vpop.eup %2626 }
 0x769   :  { %v1684_v44 = vmul.f32 %v2627_v40, %v2625_v35 }
 0x76b   :  { %1757 = vmatmul.mubr.f32.vlgmr.msra.gmra.mrb[14].mxu0 %v1684_v44  ;;  %1828 = vmatmul.mubr.f32.vlgmr.msra.gmra.mrb[14].mxu1 %v1684_v44 }
 0x83e   :  { %v1758_v48 = vpop.f32.mrb[14].mxu0  ;;  %v1829_v54 = vpop.f32.mrb[14].mxu1 }
 0x83f   :  { %v2457_v58 = vadd.f32 %v1758_v48, %v2986_v6  ;;  %v1760_v59 = vpop.f32.mrb[15].mxu0  ;;  %v1831_v61 = vpop.f32.mrb[15].mxu1  ;;  %v2473_v63 = vadd.f32 %v1829_v54, %v2995_v34 }
 0x840   :  { %v2458_v55 = vadd.f32 %v1760_v59, %v2988_v8  ;;  %v2474_v57 = vadd.f32 %v1831_v61, %v2992_v29 }
 0x841   :  { %v1928_v5 = vmul.f32 -1.442695, %v2457_v58 }
 0x842   :  { %v1929_v9 = vmul.f32 -1.442695, %v2458_v55  ;;  %v1930_v62 = vmul.f32 -1.442695, %v2474_v57 }
 0x843   :  { %2628 = vpow2.f32 %v1928_v5 }
 0x844   :  { %2630 = vpow2.f32 %v1929_v9 }
 0x845   :  { %2632 = vpow2.f32 %v1930_v62 }
 0x846   :  { %2634 = vtanh.f32 %v2473_v63 }
 0x84d   :  { %v2629_v2 = vpop.eup %2628 }
 0x84e   :  { %v2631_v13 = vpop.eup %2630  ;;  %v1841_v14 = vadd.f32 1.0, %v2629_v2 }
 0x84f   :  { %v1847_v16 = vadd.f32 1.0, %v2631_v13  ;;  %v2633_v6 = vpop.eup %2632 }
 0x850   :  { %2636 = vrcp.f32 %v1841_v14  ;;  %v2635_v18 = vpop.eup %2634  ;;  %v1854_v25 = vadd.f32 1.0, %v2633_v6 }
 0x851   :  { %2638 = vrcp.f32 %v1847_v16 }
 0x852   :  { %2640 = vrcp.f32 %v1854_v25 }
 0x85a   :  { %v2637_v8 = vpop.eup %2636 }
 0x85b   :  { %v2639_v20 = vpop.eup %2638  ;;  %v1858_v22 = vmul.f32 %v2637_v8, %v2635_v18 }
 0x85c   :  { %v1857_v10 = vmul.f32 %v2639_v20, %v1682_v30  ;;  %v2641_v29 = vpop.eup %2640 }
 0x85e   :  { %v1859_v27 = vadd.f32 %v1858_v22, %v1857_v10 }
 0x860   :  { %2642 = vtanh.f32 %v1859_v27 }
 0x86a   :  { %v2643_v34 = vpop.eup %2642 }
 0x86b   :  { %v1861_v11 = vmul.f32 %v2643_v34, %v2641_v29 }
 0x86d   :  { %1867 = vst [vmem:[#allocation11] sm:$0xff] %v1861_v11 }
 0x86e   :  { %2721 = shalt.err (!%p2718_p0)
}
 0x86f   :  { %s2722_s6 = scalar_lea.hbm %s3268_s4, 128 }
 0x870   :  { %p2723_p1 = scmp.ne.s32.totalorder %s3268_s4, %s2722_s6  ;;  %p2726_p2 = scmp.lt.u32.totalorder %s2722_s6, %s3268_s4 }
 0x872   :  { %p2728_p3 = pnand %p2726_p2, %p2723_p1 }
 0x874   :  { %2731 = shalt.err (!%p2728_p3)
}
 0x875   :  { %1877 = dma.vmem_to_hbm [thread:$0]  %s1875_s28, 128, %s3268_s4, [#allocation7]  }
 0x876   :  { %2736 = dma.done.wait [#allocation7], 128  }
 0x877   :  { %2737 = vsyncadd [#allocation7], 4294967168 }
 0x878   :  { %1881 = vsyncpa [#allocation6], 1 }
 0x879   :  { %1882 = vsyncpa [#allocation9], 1 }
 0x87a   :  { %1883 = vsyncpa [#allocation7], 1 }

</bundles_post_ra>
